<compile_context>
chip_gen: v5e
topology: v5e:2x2
jax: 0.10.0
libtpu: 0.0.40
codegen_flags: <defaults>
</compile_context>

<pallas_src>
import jax
import jax.numpy as jnp
from jax.experimental import pallas as pl
from jax.experimental.pallas import tpu as pltpu


def gru_kernel(x2d_ref, h0_ref,
               wih_r_ref, wih_z_ref, wih_n_ref,
               whh_r_ref, whh_z_ref, whh_n_ref,
               bias_ref, out_ref):
    # x2d_ref:   (S*B, E)  embedded tokens, flattened over time+batch
    # h0_ref:    (B, L)    initial hidden state
    # wih_*_ref: (E, L)    per-gate input->hidden weights (pre-transposed)
    # whh_*_ref: (L, L)    per-gate hidden->hidden weights (pre-transposed)
    # bias_ref:  (4, L)    rows: [b_ir+b_hr, b_iz+b_hz, b_in, b_hn]
    # out_ref:   (S, B, L) full-sequence output (resident in VMEM)
    S, B, L = out_ref.shape

    x2d = x2d_ref[...]                     # (S*B, E)
    b_r = bias_ref[0:1, :]                 # (1, L)  folded b_ir + b_hr
    b_z = bias_ref[1:2, :]                 # (1, L)  folded b_iz + b_hz
    b_in = bias_ref[2:3, :]                # (1, L)
    b_hn = bias_ref[3:4, :]                # (1, L)

    # Hoisted input-gate projections: one big MXU dot per gate, all timesteps.
    gx_r = jnp.dot(x2d, wih_r_ref[...], preferred_element_type=jnp.float32) + b_r
    gx_z = jnp.dot(x2d, wih_z_ref[...], preferred_element_type=jnp.float32) + b_z
    gx_n = jnp.dot(x2d, wih_n_ref[...], preferred_element_type=jnp.float32) + b_in

    w_hr = whh_r_ref[...]
    w_hz = whh_z_ref[...]
    w_hn = whh_n_ref[...]

    h = h0_ref[...]                        # (B, L)

    # Fully unrolled static recurrence (S is small & compile-time constant;
    # total vreg pressure ~30/64, no spills).
    for t in range(S):
        lo, hi = t * B, (t + 1) * B
        gh_r = jnp.dot(h, w_hr, preferred_element_type=jnp.float32)
        gh_z = jnp.dot(h, w_hz, preferred_element_type=jnp.float32)
        gh_n = jnp.dot(h, w_hn, preferred_element_type=jnp.float32) + b_hn
        # PyTorch GRU gate equations (r, z, n ordering):
        r = jax.nn.sigmoid(gx_r[lo:hi] + gh_r)
        z = jax.nn.sigmoid(gx_z[lo:hi] + gh_z)
        n = jnp.tanh(gx_n[lo:hi] + r * gh_n)
        # h = (1 - z) * n + z * h, rewritten with one fewer VPU op:
        h = n + z * (h - n)
        out_ref[t] = h


def encoder_forward(x_tokens, h0, emb_table, w_ih, w_hh, b_ih, b_hh):
    """x_tokens: (S, B) int32; h0: (1, B, L). Returns (S, B, L) float32."""
    S, B = x_tokens.shape
    L = h0.shape[-1]
    E = emb_table.shape[-1]

    # Glue: embedding gather (nn.Embedding) in plain JAX.
    # TODO(synk): embedding lookup stays outside the kernel (data-dependent
    # gather; cleanest as an XLA gather feeding the kernel).
    x_emb = emb_table[x_tokens]                            # (S, B, E) f32
    x2d = x_emb.reshape(S * B, E)

    # Per-gate weight splits (PyTorch packs rows as [r; z; n]); transpose so
    # the kernel does (rows, in) @ (in, L) without in-kernel relayouts.
    wih_r = jnp.transpose(w_ih[0:L])                       # (E, L)
    wih_z = jnp.transpose(w_ih[L:2 * L])                   # (E, L)
    wih_n = jnp.transpose(w_ih[2 * L:3 * L])               # (E, L)
    whh_r = jnp.transpose(w_hh[0:L])                       # (L, L)
    whh_z = jnp.transpose(w_hh[L:2 * L])                   # (L, L)
    whh_n = jnp.transpose(w_hh[2 * L:3 * L])               # (L, L)

    # Folded biases: r/z gates take b_ih+b_hh together; n gate keeps them
    # separate because b_hn sits inside the r * (.) term.
    bias = jnp.stack(
        [b_ih[0:L] + b_hh[0:L],
         b_ih[L:2 * L] + b_hh[L:2 * L],
         b_ih[2 * L:3 * L],
         b_hh[2 * L:3 * L]],
        axis=0,
    )                                                      # (4, L)

    h0_2d = h0.reshape(B, L)

    out = pl.pallas_call(
        gru_kernel,
        out_shape=jax.ShapeDtypeStruct((S, B, L), jnp.float32),
        grid_spec=pltpu.PrefetchScalarGridSpec(
            num_scalar_prefetch=0,
            grid=(1,),
            in_specs=[
                pl.BlockSpec((S * B, E), lambda i: (0, 0)),    # x2d
                pl.BlockSpec((B, L), lambda i: (0, 0)),        # h0
                pl.BlockSpec((E, L), lambda i: (0, 0)),        # W_ir^T
                pl.BlockSpec((E, L), lambda i: (0, 0)),        # W_iz^T
                pl.BlockSpec((E, L), lambda i: (0, 0)),        # W_in^T
                pl.BlockSpec((L, L), lambda i: (0, 0)),        # W_hr^T
                pl.BlockSpec((L, L), lambda i: (0, 0)),        # W_hz^T
                pl.BlockSpec((L, L), lambda i: (0, 0)),        # W_hn^T
                pl.BlockSpec((4, L), lambda i: (0, 0)),        # folded biases
            ],
            out_specs=pl.BlockSpec((S, B, L), lambda i: (0, 0, 0)),
        ),
        compiler_params=pltpu.CompilerParams(
            dimension_semantics=("arbitrary",),   # single step; recurrence is serial
        ),
    )(x2d, h0_2d, wih_r, wih_z, wih_n, whh_r, whh_z, whh_n, bias)
    return out


if __name__ == "__main__":
    # Small shapes consistent with the module:
    #   in_size (vocab), emb_size, latent_size=64, seq-first GRU.
    in_size = 20       # len(vocEng) stand-in
    emb_size = 32
    latent_size = 64
    seq_len = 8
    batch = 8

    key = jax.random.PRNGKey(0)
    k_emb, k_wih, k_whh, k_bih, k_bhh, k_tok, k_h = jax.random.split(key, 7)

    # Deterministic synthetic parameters (shapes per nn.Embedding / nn.GRU).
    emb_table = jax.random.normal(k_emb, (in_size, emb_size), jnp.float32) * 0.1
    w_ih = jax.random.normal(k_wih, (3 * latent_size, emb_size), jnp.float32) * 0.1
    w_hh = jax.random.normal(k_whh, (3 * latent_size, latent_size), jnp.float32) * 0.1
    b_ih = jax.random.normal(k_bih, (3 * latent_size,), jnp.float32) * 0.1
    b_hh = jax.random.normal(k_bhh, (3 * latent_size,), jnp.float32) * 0.1

    x_tokens = jax.random.randint(k_tok, (seq_len, batch), 0, in_size, jnp.int32)
    h0 = jax.random.normal(k_h, (1, batch, latent_size), jnp.float32) * 0.1

    out = encoder_forward(x_tokens, h0, emb_table, w_ih, w_hh, b_ih, b_hh)
    out = jax.block_until_ready(out)

    # Pure-JAX reference of the same GRU recurrence for a sanity check.
    def ref(x_tokens, h0):
        xe = emb_table[x_tokens]
        h = h0[0]
        outs = []
        L = latent_size
        for t in range(seq_len):
            gx = xe[t] @ w_ih.T + b_ih
            gh = h @ w_hh.T + b_hh
            r = jax.nn.sigmoid(gx[:, :L] + gh[:, :L])
            z = jax.nn.sigmoid(gx[:, L:2 * L] + gh[:, L:2 * L])
            n = jnp.tanh(gx[:, 2 * L:] + r * gh[:, 2 * L:])
            h = (1.0 - z) * n + z * h
            outs.append(h)
        return jnp.stack(outs, axis=0)

    expected = ref(x_tokens, h0)
    assert out.shape == (seq_len, batch, latent_size)
    assert jnp.allclose(out, expected, atol=2e-5, rtol=2e-5)

    print("KERNEL_OK")
</pallas_src>

<mosaic_0001>
module attributes {stable_mosaic.version = 11 : i64} {
  func.func @gru_kernel(%arg0: i32, %arg1: memref<64x32xf32, #tpu.memory_space<vmem>>, %arg2: memref<8x64xf32, #tpu.memory_space<vmem>>, %arg3: memref<32x64xf32, #tpu.memory_space<vmem>>, %arg4: memref<32x64xf32, #tpu.memory_space<vmem>>, %arg5: memref<32x64xf32, #tpu.memory_space<vmem>>, %arg6: memref<64x64xf32, #tpu.memory_space<vmem>>, %arg7: memref<64x64xf32, #tpu.memory_space<vmem>>, %arg8: memref<64x64xf32, #tpu.memory_space<vmem>>, %arg9: memref<4x64xf32, #tpu.memory_space<vmem>>, %arg10: memref<8x8x64xf32, #tpu.memory_space<vmem>>) attributes {dimension_semantics = [#tpu.dimension_semantics<arbitrary>], iteration_bounds = array<i64: 1>, scalar_prefetch = 0 : i64, scratch_operands = 0 : i64, tpu.core_type = #tpu.core_type<tc>, window_params = [{pipeline_mode = #tpu.pipeline_mode<synchronous>, transform_indices = @transform_0, window_bounds = array<i64: 64, 32>}, {pipeline_mode = #tpu.pipeline_mode<synchronous>, transform_indices = @transform_1, window_bounds = array<i64: 8, 64>}, {pipeline_mode = #tpu.pipeline_mode<synchronous>, transform_indices = @transform_2, window_bounds = array<i64: 32, 64>}, {pipeline_mode = #tpu.pipeline_mode<synchronous>, transform_indices = @transform_3, window_bounds = array<i64: 32, 64>}, {pipeline_mode = #tpu.pipeline_mode<synchronous>, transform_indices = @transform_4, window_bounds = array<i64: 32, 64>}, {pipeline_mode = #tpu.pipeline_mode<synchronous>, transform_indices = @transform_5, window_bounds = array<i64: 64, 64>}, {pipeline_mode = #tpu.pipeline_mode<synchronous>, transform_indices = @transform_6, window_bounds = array<i64: 64, 64>}, {pipeline_mode = #tpu.pipeline_mode<synchronous>, transform_indices = @transform_7, window_bounds = array<i64: 64, 64>}, {pipeline_mode = #tpu.pipeline_mode<synchronous>, transform_indices = @transform_8, window_bounds = array<i64: 4, 64>}, {pipeline_mode = #tpu.pipeline_mode<synchronous>, transform_indices = @transform_9, window_bounds = array<i64: 8, 8, 64>}]} {
    %c0 = arith.constant 0 : index
    %c0_0 = arith.constant 0 : index
    %0 = vector.load %arg1[%c0, %c0_0] : memref<64x32xf32, #tpu.memory_space<vmem>>, vector<64x32xf32>
    %c0_1 = arith.constant 0 : index
    %c0_2 = arith.constant 0 : index
    %1 = vector.load %arg9[%c0_1, %c0_2] : memref<4x64xf32, #tpu.memory_space<vmem>>, vector<1x64xf32>
    %c1 = arith.constant 1 : index
    %c0_3 = arith.constant 0 : index
    %2 = vector.load %arg9[%c1, %c0_3] : memref<4x64xf32, #tpu.memory_space<vmem>>, vector<1x64xf32>
    %c2 = arith.constant 2 : index
    %c0_4 = arith.constant 0 : index
    %3 = vector.load %arg9[%c2, %c0_4] : memref<4x64xf32, #tpu.memory_space<vmem>>, vector<1x64xf32>
    %c3 = arith.constant 3 : index
    %c0_5 = arith.constant 0 : index
    %4 = vector.load %arg9[%c3, %c0_5] : memref<4x64xf32, #tpu.memory_space<vmem>>, vector<1x64xf32>
    %c0_6 = arith.constant 0 : index
    %c0_7 = arith.constant 0 : index
    %5 = vector.load %arg3[%c0_6, %c0_7] : memref<32x64xf32, #tpu.memory_space<vmem>>, vector<32x64xf32>
    %cst = arith.constant dense<0.000000e+00> : vector<64x64xf32>
    %6 = tpu.matmul %0, %5, %cst {dimension_numbers = #tpu.dot_dimension_numbers<[1], [0], [0], [1], [0, 0, 1, 1], [], []>} : vector<64x32xf32>, vector<32x64xf32>, vector<64x64xf32> -> vector<64x64xf32>
    %7 = vector.broadcast %1 : vector<1x64xf32> to vector<64x64xf32>
    %8 = arith.addf %6, %7 : vector<64x64xf32>
    %c0_8 = arith.constant 0 : index
    %c0_9 = arith.constant 0 : index
    %9 = vector.load %arg4[%c0_8, %c0_9] : memref<32x64xf32, #tpu.memory_space<vmem>>, vector<32x64xf32>
    %cst_10 = arith.constant dense<0.000000e+00> : vector<64x64xf32>
    %10 = tpu.matmul %0, %9, %cst_10 {dimension_numbers = #tpu.dot_dimension_numbers<[1], [0], [0], [1], [0, 0, 1, 1], [], []>} : vector<64x32xf32>, vector<32x64xf32>, vector<64x64xf32> -> vector<64x64xf32>
    %11 = vector.broadcast %2 : vector<1x64xf32> to vector<64x64xf32>
    %12 = arith.addf %10, %11 : vector<64x64xf32>
    %c0_11 = arith.constant 0 : index
    %c0_12 = arith.constant 0 : index
    %13 = vector.load %arg5[%c0_11, %c0_12] : memref<32x64xf32, #tpu.memory_space<vmem>>, vector<32x64xf32>
    %cst_13 = arith.constant dense<0.000000e+00> : vector<64x64xf32>
    %14 = tpu.matmul %0, %13, %cst_13 {dimension_numbers = #tpu.dot_dimension_numbers<[1], [0], [0], [1], [0, 0, 1, 1], [], []>} : vector<64x32xf32>, vector<32x64xf32>, vector<64x64xf32> -> vector<64x64xf32>
    %15 = vector.broadcast %3 : vector<1x64xf32> to vector<64x64xf32>
    %16 = arith.addf %14, %15 : vector<64x64xf32>
    %c0_14 = arith.constant 0 : index
    %c0_15 = arith.constant 0 : index
    %17 = vector.load %arg6[%c0_14, %c0_15] : memref<64x64xf32, #tpu.memory_space<vmem>>, vector<64x64xf32>
    %c0_16 = arith.constant 0 : index
    %c0_17 = arith.constant 0 : index
    %18 = vector.load %arg7[%c0_16, %c0_17] : memref<64x64xf32, #tpu.memory_space<vmem>>, vector<64x64xf32>
    %c0_18 = arith.constant 0 : index
    %c0_19 = arith.constant 0 : index
    %19 = vector.load %arg8[%c0_18, %c0_19] : memref<64x64xf32, #tpu.memory_space<vmem>>, vector<64x64xf32>
    %c0_20 = arith.constant 0 : index
    %c0_21 = arith.constant 0 : index
    %20 = vector.load %arg2[%c0_20, %c0_21] : memref<8x64xf32, #tpu.memory_space<vmem>>, vector<8x64xf32>
    %cst_22 = arith.constant dense<0.000000e+00> : vector<8x64xf32>
    %21 = tpu.matmul %20, %17, %cst_22 {dimension_numbers = #tpu.dot_dimension_numbers<[1], [0], [0], [1], [0, 0, 1, 1], [], []>} : vector<8x64xf32>, vector<64x64xf32>, vector<8x64xf32> -> vector<8x64xf32>
    %cst_23 = arith.constant dense<0.000000e+00> : vector<8x64xf32>
    %22 = tpu.matmul %20, %18, %cst_23 {dimension_numbers = #tpu.dot_dimension_numbers<[1], [0], [0], [1], [0, 0, 1, 1], [], []>} : vector<8x64xf32>, vector<64x64xf32>, vector<8x64xf32> -> vector<8x64xf32>
    %cst_24 = arith.constant dense<0.000000e+00> : vector<8x64xf32>
    %23 = tpu.matmul %20, %19, %cst_24 {dimension_numbers = #tpu.dot_dimension_numbers<[1], [0], [0], [1], [0, 0, 1, 1], [], []>} : vector<8x64xf32>, vector<64x64xf32>, vector<8x64xf32> -> vector<8x64xf32>
    %24 = vector.broadcast %4 : vector<1x64xf32> to vector<8x64xf32>
    %25 = arith.addf %23, %24 : vector<8x64xf32>
    %26 = vector.extract_strided_slice %8 {offsets = [0, 0], sizes = [8, 64], strides = [1, 1]} : vector<64x64xf32> to vector<8x64xf32>
    %27 = arith.addf %26, %21 : vector<8x64xf32>
    %28 = arith.negf %27 : vector<8x64xf32>
    %29 = math.exp %28 : vector<8x64xf32>
    %cst_25 = arith.constant 1.000000e+00 : f32
    %30 = vector.broadcast %cst_25 : f32 to vector<8x64xf32>
    %31 = arith.addf %30, %29 : vector<8x64xf32>
    %32 = arith.divf %30, %31 : vector<8x64xf32>
    %33 = vector.extract_strided_slice %12 {offsets = [0, 0], sizes = [8, 64], strides = [1, 1]} : vector<64x64xf32> to vector<8x64xf32>
    %34 = arith.addf %33, %22 : vector<8x64xf32>
    %35 = arith.negf %34 : vector<8x64xf32>
    %36 = math.exp %35 : vector<8x64xf32>
    %cst_26 = arith.constant 1.000000e+00 : f32
    %37 = vector.broadcast %cst_26 : f32 to vector<8x64xf32>
    %38 = arith.addf %37, %36 : vector<8x64xf32>
    %39 = arith.divf %37, %38 : vector<8x64xf32>
    %40 = vector.extract_strided_slice %16 {offsets = [0, 0], sizes = [8, 64], strides = [1, 1]} : vector<64x64xf32> to vector<8x64xf32>
    %41 = arith.mulf %32, %25 : vector<8x64xf32>
    %42 = arith.addf %40, %41 : vector<8x64xf32>
    %43 = math.tanh %42 : vector<8x64xf32>
    %44 = arith.subf %20, %43 : vector<8x64xf32>
    %45 = arith.mulf %39, %44 : vector<8x64xf32>
    %46 = arith.addf %43, %45 : vector<8x64xf32>
    %c0_27 = arith.constant 0 : index
    %c0_28 = arith.constant 0 : index
    %c0_29 = arith.constant 0 : index
    %47 = vector.load %arg10[%c0_27, %c0_28, %c0_29] : memref<8x8x64xf32, #tpu.memory_space<vmem>>, vector<1x8x64xf32>
    %48 = vector.shape_cast %47 : vector<1x8x64xf32> to vector<8x64xf32>
    %49 = vector.shape_cast %46 : vector<8x64xf32> to vector<1x8x64xf32>
    tpu.vector_store %arg10[%c0_27, %c0_28, %c0_29], %49 {strides = array<i32>} : memref<8x8x64xf32, #tpu.memory_space<vmem>>, vector<1x8x64xf32>,
    %cst_30 = arith.constant dense<0.000000e+00> : vector<8x64xf32>
    %50 = tpu.matmul %46, %17, %cst_30 {dimension_numbers = #tpu.dot_dimension_numbers<[1], [0], [0], [1], [0, 0, 1, 1], [], []>} : vector<8x64xf32>, vector<64x64xf32>, vector<8x64xf32> -> vector<8x64xf32>
    %cst_31 = arith.constant dense<0.000000e+00> : vector<8x64xf32>
    %51 = tpu.matmul %46, %18, %cst_31 {dimension_numbers = #tpu.dot_dimension_numbers<[1], [0], [0], [1], [0, 0, 1, 1], [], []>} : vector<8x64xf32>, vector<64x64xf32>, vector<8x64xf32> -> vector<8x64xf32>
    %cst_32 = arith.constant dense<0.000000e+00> : vector<8x64xf32>
    %52 = tpu.matmul %46, %19, %cst_32 {dimension_numbers = #tpu.dot_dimension_numbers<[1], [0], [0], [1], [0, 0, 1, 1], [], []>} : vector<8x64xf32>, vector<64x64xf32>, vector<8x64xf32> -> vector<8x64xf32>
    %53 = vector.broadcast %4 : vector<1x64xf32> to vector<8x64xf32>
    %54 = arith.addf %52, %53 : vector<8x64xf32>
    %55 = vector.extract_strided_slice %8 {offsets = [8, 0], sizes = [8, 64], strides = [1, 1]} : vector<64x64xf32> to vector<8x64xf32>
    %56 = arith.addf %55, %50 : vector<8x64xf32>
    %57 = arith.negf %56 : vector<8x64xf32>
    %58 = math.exp %57 : vector<8x64xf32>
    %cst_33 = arith.constant 1.000000e+00 : f32
    %59 = vector.broadcast %cst_33 : f32 to vector<8x64xf32>
    %60 = arith.addf %59, %58 : vector<8x64xf32>
    %61 = arith.divf %59, %60 : vector<8x64xf32>
    %62 = vector.extract_strided_slice %12 {offsets = [8, 0], sizes = [8, 64], strides = [1, 1]} : vector<64x64xf32> to vector<8x64xf32>
    %63 = arith.addf %62, %51 : vector<8x64xf32>
    %64 = arith.negf %63 : vector<8x64xf32>
    %65 = math.exp %64 : vector<8x64xf32>
    %cst_34 = arith.constant 1.000000e+00 : f32
    %66 = vector.broadcast %cst_34 : f32 to vector<8x64xf32>
    %67 = arith.addf %66, %65 : vector<8x64xf32>
    %68 = arith.divf %66, %67 : vector<8x64xf32>
    %69 = vector.extract_strided_slice %16 {offsets = [8, 0], sizes = [8, 64], strides = [1, 1]} : vector<64x64xf32> to vector<8x64xf32>
    %70 = arith.mulf %61, %54 : vector<8x64xf32>
    %71 = arith.addf %69, %70 : vector<8x64xf32>
    %72 = math.tanh %71 : vector<8x64xf32>
    %73 = arith.subf %46, %72 : vector<8x64xf32>
    %74 = arith.mulf %68, %73 : vector<8x64xf32>
    %75 = arith.addf %72, %74 : vector<8x64xf32>
    %c1_35 = arith.constant 1 : index
    %c0_36 = arith.constant 0 : index
    %c0_37 = arith.constant 0 : index
    %76 = vector.load %arg10[%c1_35, %c0_36, %c0_37] : memref<8x8x64xf32, #tpu.memory_space<vmem>>, vector<1x8x64xf32>
    %77 = vector.shape_cast %76 : vector<1x8x64xf32> to vector<8x64xf32>
    %78 = vector.shape_cast %75 : vector<8x64xf32> to vector<1x8x64xf32>
    tpu.vector_store %arg10[%c1_35, %c0_36, %c0_37], %78 {strides = array<i32>} : memref<8x8x64xf32, #tpu.memory_space<vmem>>, vector<1x8x64xf32>,
    %cst_38 = arith.constant dense<0.000000e+00> : vector<8x64xf32>
    %79 = tpu.matmul %75, %17, %cst_38 {dimension_numbers = #tpu.dot_dimension_numbers<[1], [0], [0], [1], [0, 0, 1, 1], [], []>} : vector<8x64xf32>, vector<64x64xf32>, vector<8x64xf32> -> vector<8x64xf32>
    %cst_39 = arith.constant dense<0.000000e+00> : vector<8x64xf32>
    %80 = tpu.matmul %75, %18, %cst_39 {dimension_numbers = #tpu.dot_dimension_numbers<[1], [0], [0], [1], [0, 0, 1, 1], [], []>} : vector<8x64xf32>, vector<64x64xf32>, vector<8x64xf32> -> vector<8x64xf32>
    %cst_40 = arith.constant dense<0.000000e+00> : vector<8x64xf32>
    %81 = tpu.matmul %75, %19, %cst_40 {dimension_numbers = #tpu.dot_dimension_numbers<[1], [0], [0], [1], [0, 0, 1, 1], [], []>} : vector<8x64xf32>, vector<64x64xf32>, vector<8x64xf32> -> vector<8x64xf32>
    %82 = vector.broadcast %4 : vector<1x64xf32> to vector<8x64xf32>
    %83 = arith.addf %81, %82 : vector<8x64xf32>
    %84 = vector.extract_strided_slice %8 {offsets = [16, 0], sizes = [8, 64], strides = [1, 1]} : vector<64x64xf32> to vector<8x64xf32>
    %85 = arith.addf %84, %79 : vector<8x64xf32>
    %86 = arith.negf %85 : vector<8x64xf32>
    %87 = math.exp %86 : vector<8x64xf32>
    %cst_41 = arith.constant 1.000000e+00 : f32
    %88 = vector.broadcast %cst_41 : f32 to vector<8x64xf32>
    %89 = arith.addf %88, %87 : vector<8x64xf32>
    %90 = arith.divf %88, %89 : vector<8x64xf32>
    %91 = vector.extract_strided_slice %12 {offsets = [16, 0], sizes = [8, 64], strides = [1, 1]} : vector<64x64xf32> to vector<8x64xf32>
    %92 = arith.addf %91, %80 : vector<8x64xf32>
    %93 = arith.negf %92 : vector<8x64xf32>
    %94 = math.exp %93 : vector<8x64xf32>
    %cst_42 = arith.constant 1.000000e+00 : f32
    %95 = vector.broadcast %cst_42 : f32 to vector<8x64xf32>
    %96 = arith.addf %95, %94 : vector<8x64xf32>
    %97 = arith.divf %95, %96 : vector<8x64xf32>
    %98 = vector.extract_strided_slice %16 {offsets = [16, 0], sizes = [8, 64], strides = [1, 1]} : vector<64x64xf32> to vector<8x64xf32>
    %99 = arith.mulf %90, %83 : vector<8x64xf32>
    %100 = arith.addf %98, %99 : vector<8x64xf32>
    %101 = math.tanh %100 : vector<8x64xf32>
    %102 = arith.subf %75, %101 : vector<8x64xf32>
    %103 = arith.mulf %97, %102 : vector<8x64xf32>
    %104 = arith.addf %101, %103 : vector<8x64xf32>
    %c2_43 = arith.constant 2 : index
    %c0_44 = arith.constant 0 : index
    %c0_45 = arith.constant 0 : index
    %105 = vector.load %arg10[%c2_43, %c0_44, %c0_45] : memref<8x8x64xf32, #tpu.memory_space<vmem>>, vector<1x8x64xf32>
    %106 = vector.shape_cast %105 : vector<1x8x64xf32> to vector<8x64xf32>
    %107 = vector.shape_cast %104 : vector<8x64xf32> to vector<1x8x64xf32>
    tpu.vector_store %arg10[%c2_43, %c0_44, %c0_45], %107 {strides = array<i32>} : memref<8x8x64xf32, #tpu.memory_space<vmem>>, vector<1x8x64xf32>,
    %cst_46 = arith.constant dense<0.000000e+00> : vector<8x64xf32>
    %108 = tpu.matmul %104, %17, %cst_46 {dimension_numbers = #tpu.dot_dimension_numbers<[1], [0], [0], [1], [0, 0, 1, 1], [], []>} : vector<8x64xf32>, vector<64x64xf32>, vector<8x64xf32> -> vector<8x64xf32>
    %cst_47 = arith.constant dense<0.000000e+00> : vector<8x64xf32>
    %109 = tpu.matmul %104, %18, %cst_47 {dimension_numbers = #tpu.dot_dimension_numbers<[1], [0], [0], [1], [0, 0, 1, 1], [], []>} : vector<8x64xf32>, vector<64x64xf32>, vector<8x64xf32> -> vector<8x64xf32>
    %cst_48 = arith.constant dense<0.000000e+00> : vector<8x64xf32>
    %110 = tpu.matmul %104, %19, %cst_48 {dimension_numbers = #tpu.dot_dimension_numbers<[1], [0], [0], [1], [0, 0, 1, 1], [], []>} : vector<8x64xf32>, vector<64x64xf32>, vector<8x64xf32> -> vector<8x64xf32>
    %111 = vector.broadcast %4 : vector<1x64xf32> to vector<8x64xf32>
    %112 = arith.addf %110, %111 : vector<8x64xf32>
    %113 = vector.extract_strided_slice %8 {offsets = [24, 0], sizes = [8, 64], strides = [1, 1]} : vector<64x64xf32> to vector<8x64xf32>
    %114 = arith.addf %113, %108 : vector<8x64xf32>
    %115 = arith.negf %114 : vector<8x64xf32>
    %116 = math.exp %115 : vector<8x64xf32>
    %cst_49 = arith.constant 1.000000e+00 : f32
    %117 = vector.broadcast %cst_49 : f32 to vector<8x64xf32>
    %118 = arith.addf %117, %116 : vector<8x64xf32>
    %119 = arith.divf %117, %118 : vector<8x64xf32>
    %120 = vector.extract_strided_slice %12 {offsets = [24, 0], sizes = [8, 64], strides = [1, 1]} : vector<64x64xf32> to vector<8x64xf32>
    %121 = arith.addf %120, %109 : vector<8x64xf32>
    %122 = arith.negf %121 : vector<8x64xf32>
    %123 = math.exp %122 : vector<8x64xf32>
    %cst_50 = arith.constant 1.000000e+00 : f32
    %124 = vector.broadcast %cst_50 : f32 to vector<8x64xf32>
    %125 = arith.addf %124, %123 : vector<8x64xf32>
    %126 = arith.divf %124, %125 : vector<8x64xf32>
    %127 = vector.extract_strided_slice %16 {offsets = [24, 0], sizes = [8, 64], strides = [1, 1]} : vector<64x64xf32> to vector<8x64xf32>
    %128 = arith.mulf %119, %112 : vector<8x64xf32>
    %129 = arith.addf %127, %128 : vector<8x64xf32>
    %130 = math.tanh %129 : vector<8x64xf32>
    %131 = arith.subf %104, %130 : vector<8x64xf32>
    %132 = arith.mulf %126, %131 : vector<8x64xf32>
    %133 = arith.addf %130, %132 : vector<8x64xf32>
    %c3_51 = arith.constant 3 : index
    %c0_52 = arith.constant 0 : index
    %c0_53 = arith.constant 0 : index
    %134 = vector.load %arg10[%c3_51, %c0_52, %c0_53] : memref<8x8x64xf32, #tpu.memory_space<vmem>>, vector<1x8x64xf32>
    %135 = vector.shape_cast %134 : vector<1x8x64xf32> to vector<8x64xf32>
    %136 = vector.shape_cast %133 : vector<8x64xf32> to vector<1x8x64xf32>
    tpu.vector_store %arg10[%c3_51, %c0_52, %c0_53], %136 {strides = array<i32>} : memref<8x8x64xf32, #tpu.memory_space<vmem>>, vector<1x8x64xf32>,
    %cst_54 = arith.constant dense<0.000000e+00> : vector<8x64xf32>
    %137 = tpu.matmul %133, %17, %cst_54 {dimension_numbers = #tpu.dot_dimension_numbers<[1], [0], [0], [1], [0, 0, 1, 1], [], []>} : vector<8x64xf32>, vector<64x64xf32>, vector<8x64xf32> -> vector<8x64xf32>
    %cst_55 = arith.constant dense<0.000000e+00> : vector<8x64xf32>
    %138 = tpu.matmul %133, %18, %cst_55 {dimension_numbers = #tpu.dot_dimension_numbers<[1], [0], [0], [1], [0, 0, 1, 1], [], []>} : vector<8x64xf32>, vector<64x64xf32>, vector<8x64xf32> -> vector<8x64xf32>
    %cst_56 = arith.constant dense<0.000000e+00> : vector<8x64xf32>
    %139 = tpu.matmul %133, %19, %cst_56 {dimension_numbers = #tpu.dot_dimension_numbers<[1], [0], [0], [1], [0, 0, 1, 1], [], []>} : vector<8x64xf32>, vector<64x64xf32>, vector<8x64xf32> -> vector<8x64xf32>
    %140 = vector.broadcast %4 : vector<1x64xf32> to vector<8x64xf32>
    %141 = arith.addf %139, %140 : vector<8x64xf32>
    %142 = vector.extract_strided_slice %8 {offsets = [32, 0], sizes = [8, 64], strides = [1, 1]} : vector<64x64xf32> to vector<8x64xf32>
    %143 = arith.addf %142, %137 : vector<8x64xf32>
    %144 = arith.negf %143 : vector<8x64xf32>
    %145 = math.exp %144 : vector<8x64xf32>
    %cst_57 = arith.constant 1.000000e+00 : f32
    %146 = vector.broadcast %cst_57 : f32 to vector<8x64xf32>
    %147 = arith.addf %146, %145 : vector<8x64xf32>
    %148 = arith.divf %146, %147 : vector<8x64xf32>
    %149 = vector.extract_strided_slice %12 {offsets = [32, 0], sizes = [8, 64], strides = [1, 1]} : vector<64x64xf32> to vector<8x64xf32>
    %150 = arith.addf %149, %138 : vector<8x64xf32>
    %151 = arith.negf %150 : vector<8x64xf32>
    %152 = math.exp %151 : vector<8x64xf32>
    %cst_58 = arith.constant 1.000000e+00 : f32
    %153 = vector.broadcast %cst_58 : f32 to vector<8x64xf32>
    %154 = arith.addf %153, %152 : vector<8x64xf32>
    %155 = arith.divf %153, %154 : vector<8x64xf32>
    %156 = vector.extract_strided_slice %16 {offsets = [32, 0], sizes = [8, 64], strides = [1, 1]} : vector<64x64xf32> to vector<8x64xf32>
    %157 = arith.mulf %148, %141 : vector<8x64xf32>
    %158 = arith.addf %156, %157 : vector<8x64xf32>
    %159 = math.tanh %158 : vector<8x64xf32>
    %160 = arith.subf %133, %159 : vector<8x64xf32>
    %161 = arith.mulf %155, %160 : vector<8x64xf32>
    %162 = arith.addf %159, %161 : vector<8x64xf32>
    %c4 = arith.constant 4 : index
    %c0_59 = arith.constant 0 : index
    %c0_60 = arith.constant 0 : index
    %163 = vector.load %arg10[%c4, %c0_59, %c0_60] : memref<8x8x64xf32, #tpu.memory_space<vmem>>, vector<1x8x64xf32>
    %164 = vector.shape_cast %163 : vector<1x8x64xf32> to vector<8x64xf32>
    %165 = vector.shape_cast %162 : vector<8x64xf32> to vector<1x8x64xf32>
    tpu.vector_store %arg10[%c4, %c0_59, %c0_60], %165 {strides = array<i32>} : memref<8x8x64xf32, #tpu.memory_space<vmem>>, vector<1x8x64xf32>,
    %cst_61 = arith.constant dense<0.000000e+00> : vector<8x64xf32>
    %166 = tpu.matmul %162, %17, %cst_61 {dimension_numbers = #tpu.dot_dimension_numbers<[1], [0], [0], [1], [0, 0, 1, 1], [], []>} : vector<8x64xf32>, vector<64x64xf32>, vector<8x64xf32> -> vector<8x64xf32>
    %cst_62 = arith.constant dense<0.000000e+00> : vector<8x64xf32>
    %167 = tpu.matmul %162, %18, %cst_62 {dimension_numbers = #tpu.dot_dimension_numbers<[1], [0], [0], [1], [0, 0, 1, 1], [], []>} : vector<8x64xf32>, vector<64x64xf32>, vector<8x64xf32> -> vector<8x64xf32>
    %cst_63 = arith.constant dense<0.000000e+00> : vector<8x64xf32>
    %168 = tpu.matmul %162, %19, %cst_63 {dimension_numbers = #tpu.dot_dimension_numbers<[1], [0], [0], [1], [0, 0, 1, 1], [], []>} : vector<8x64xf32>, vector<64x64xf32>, vector<8x64xf32> -> vector<8x64xf32>
    %169 = vector.broadcast %4 : vector<1x64xf32> to vector<8x64xf32>
    %170 = arith.addf %168, %169 : vector<8x64xf32>
    %171 = vector.extract_strided_slice %8 {offsets = [40, 0], sizes = [8, 64], strides = [1, 1]} : vector<64x64xf32> to vector<8x64xf32>
    %172 = arith.addf %171, %166 : vector<8x64xf32>
    %173 = arith.negf %172 : vector<8x64xf32>
    %174 = math.exp %173 : vector<8x64xf32>
    %cst_64 = arith.constant 1.000000e+00 : f32
    %175 = vector.broadcast %cst_64 : f32 to vector<8x64xf32>
    %176 = arith.addf %175, %174 : vector<8x64xf32>
    %177 = arith.divf %175, %176 : vector<8x64xf32>
    %178 = vector.extract_strided_slice %12 {offsets = [40, 0], sizes = [8, 64], strides = [1, 1]} : vector<64x64xf32> to vector<8x64xf32>
    %179 = arith.addf %178, %167 : vector<8x64xf32>
    %180 = arith.negf %179 : vector<8x64xf32>
    %181 = math.exp %180 : vector<8x64xf32>
    %cst_65 = arith.constant 1.000000e+00 : f32
    %182 = vector.broadcast %cst_65 : f32 to vector<8x64xf32>
    %183 = arith.addf %182, %181 : vector<8x64xf32>
    %184 = arith.divf %182, %183 : vector<8x64xf32>
    %185 = vector.extract_strided_slice %16 {offsets = [40, 0], sizes = [8, 64], strides = [1, 1]} : vector<64x64xf32> to vector<8x64xf32>
    %186 = arith.mulf %177, %170 : vector<8x64xf32>
    %187 = arith.addf %185, %186 : vector<8x64xf32>
    %188 = math.tanh %187 : vector<8x64xf32>
    %189 = arith.subf %162, %188 : vector<8x64xf32>
    %190 = arith.mulf %184, %189 : vector<8x64xf32>
    %191 = arith.addf %188, %190 : vector<8x64xf32>
    %c5 = arith.constant 5 : index
    %c0_66 = arith.constant 0 : index
    %c0_67 = arith.constant 0 : index
    %192 = vector.load %arg10[%c5, %c0_66, %c0_67] : memref<8x8x64xf32, #tpu.memory_space<vmem>>, vector<1x8x64xf32>
    %193 = vector.shape_cast %192 : vector<1x8x64xf32> to vector<8x64xf32>
    %194 = vector.shape_cast %191 : vector<8x64xf32> to vector<1x8x64xf32>
    tpu.vector_store %arg10[%c5, %c0_66, %c0_67], %194 {strides = array<i32>} : memref<8x8x64xf32, #tpu.memory_space<vmem>>, vector<1x8x64xf32>,
    %cst_68 = arith.constant dense<0.000000e+00> : vector<8x64xf32>
    %195 = tpu.matmul %191, %17, %cst_68 {dimension_numbers = #tpu.dot_dimension_numbers<[1], [0], [0], [1], [0, 0, 1, 1], [], []>} : vector<8x64xf32>, vector<64x64xf32>, vector<8x64xf32> -> vector<8x64xf32>
    %cst_69 = arith.constant dense<0.000000e+00> : vector<8x64xf32>
    %196 = tpu.matmul %191, %18, %cst_69 {dimension_numbers = #tpu.dot_dimension_numbers<[1], [0], [0], [1], [0, 0, 1, 1], [], []>} : vector<8x64xf32>, vector<64x64xf32>, vector<8x64xf32> -> vector<8x64xf32>
    %cst_70 = arith.constant dense<0.000000e+00> : vector<8x64xf32>
    %197 = tpu.matmul %191, %19, %cst_70 {dimension_numbers = #tpu.dot_dimension_numbers<[1], [0], [0], [1], [0, 0, 1, 1], [], []>} : vector<8x64xf32>, vector<64x64xf32>, vector<8x64xf32> -> vector<8x64xf32>
    %198 = vector.broadcast %4 : vector<1x64xf32> to vector<8x64xf32>
    %199 = arith.addf %197, %198 : vector<8x64xf32>
    %200 = vector.extract_strided_slice %8 {offsets = [48, 0], sizes = [8, 64], strides = [1, 1]} : vector<64x64xf32> to vector<8x64xf32>
    %201 = arith.addf %200, %195 : vector<8x64xf32>
    %202 = arith.negf %201 : vector<8x64xf32>
    %203 = math.exp %202 : vector<8x64xf32>
    %cst_71 = arith.constant 1.000000e+00 : f32
    %204 = vector.broadcast %cst_71 : f32 to vector<8x64xf32>
    %205 = arith.addf %204, %203 : vector<8x64xf32>
    %206 = arith.divf %204, %205 : vector<8x64xf32>
    %207 = vector.extract_strided_slice %12 {offsets = [48, 0], sizes = [8, 64], strides = [1, 1]} : vector<64x64xf32> to vector<8x64xf32>
    %208 = arith.addf %207, %196 : vector<8x64xf32>
    %209 = arith.negf %208 : vector<8x64xf32>
    %210 = math.exp %209 : vector<8x64xf32>
    %cst_72 = arith.constant 1.000000e+00 : f32
    %211 = vector.broadcast %cst_72 : f32 to vector<8x64xf32>
    %212 = arith.addf %211, %210 : vector<8x64xf32>
    %213 = arith.divf %211, %212 : vector<8x64xf32>
    %214 = vector.extract_strided_slice %16 {offsets = [48, 0], sizes = [8, 64], strides = [1, 1]} : vector<64x64xf32> to vector<8x64xf32>
    %215 = arith.mulf %206, %199 : vector<8x64xf32>
    %216 = arith.addf %214, %215 : vector<8x64xf32>
    %217 = math.tanh %216 : vector<8x64xf32>
    %218 = arith.subf %191, %217 : vector<8x64xf32>
    %219 = arith.mulf %213, %218 : vector<8x64xf32>
    %220 = arith.addf %217, %219 : vector<8x64xf32>
    %c6 = arith.constant 6 : index
    %c0_73 = arith.constant 0 : index
    %c0_74 = arith.constant 0 : index
    %221 = vector.load %arg10[%c6, %c0_73, %c0_74] : memref<8x8x64xf32, #tpu.memory_space<vmem>>, vector<1x8x64xf32>
    %222 = vector.shape_cast %221 : vector<1x8x64xf32> to vector<8x64xf32>
    %223 = vector.shape_cast %220 : vector<8x64xf32> to vector<1x8x64xf32>
    tpu.vector_store %arg10[%c6, %c0_73, %c0_74], %223 {strides = array<i32>} : memref<8x8x64xf32, #tpu.memory_space<vmem>>, vector<1x8x64xf32>,
    %cst_75 = arith.constant dense<0.000000e+00> : vector<8x64xf32>
    %224 = tpu.matmul %220, %17, %cst_75 {dimension_numbers = #tpu.dot_dimension_numbers<[1], [0], [0], [1], [0, 0, 1, 1], [], []>} : vector<8x64xf32>, vector<64x64xf32>, vector<8x64xf32> -> vector<8x64xf32>
    %cst_76 = arith.constant dense<0.000000e+00> : vector<8x64xf32>
    %225 = tpu.matmul %220, %18, %cst_76 {dimension_numbers = #tpu.dot_dimension_numbers<[1], [0], [0], [1], [0, 0, 1, 1], [], []>} : vector<8x64xf32>, vector<64x64xf32>, vector<8x64xf32> -> vector<8x64xf32>
    %cst_77 = arith.constant dense<0.000000e+00> : vector<8x64xf32>
    %226 = tpu.matmul %220, %19, %cst_77 {dimension_numbers = #tpu.dot_dimension_numbers<[1], [0], [0], [1], [0, 0, 1, 1], [], []>} : vector<8x64xf32>, vector<64x64xf32>, vector<8x64xf32> -> vector<8x64xf32>
    %227 = vector.broadcast %4 : vector<1x64xf32> to vector<8x64xf32>
    %228 = arith.addf %226, %227 : vector<8x64xf32>
    %229 = vector.extract_strided_slice %8 {offsets = [56, 0], sizes = [8, 64], strides = [1, 1]} : vector<64x64xf32> to vector<8x64xf32>
    %230 = arith.addf %229, %224 : vector<8x64xf32>
    %231 = arith.negf %230 : vector<8x64xf32>
    %232 = math.exp %231 : vector<8x64xf32>
    %cst_78 = arith.constant 1.000000e+00 : f32
    %233 = vector.broadcast %cst_78 : f32 to vector<8x64xf32>
    %234 = arith.addf %233, %232 : vector<8x64xf32>
    %235 = arith.divf %233, %234 : vector<8x64xf32>
    %236 = vector.extract_strided_slice %12 {offsets = [56, 0], sizes = [8, 64], strides = [1, 1]} : vector<64x64xf32> to vector<8x64xf32>
    %237 = arith.addf %236, %225 : vector<8x64xf32>
    %238 = arith.negf %237 : vector<8x64xf32>
    %239 = math.exp %238 : vector<8x64xf32>
    %cst_79 = arith.constant 1.000000e+00 : f32
    %240 = vector.broadcast %cst_79 : f32 to vector<8x64xf32>
    %241 = arith.addf %240, %239 : vector<8x64xf32>
    %242 = arith.divf %240, %241 : vector<8x64xf32>
    %243 = vector.extract_strided_slice %16 {offsets = [56, 0], sizes = [8, 64], strides = [1, 1]} : vector<64x64xf32> to vector<8x64xf32>
    %244 = arith.mulf %235, %228 : vector<8x64xf32>
    %245 = arith.addf %243, %244 : vector<8x64xf32>
    %246 = math.tanh %245 : vector<8x64xf32>
    %247 = arith.subf %220, %246 : vector<8x64xf32>
    %248 = arith.mulf %242, %247 : vector<8x64xf32>
    %249 = arith.addf %246, %248 : vector<8x64xf32>
    %c7 = arith.constant 7 : index
    %c0_80 = arith.constant 0 : index
    %c0_81 = arith.constant 0 : index
    %250 = vector.load %arg10[%c7, %c0_80, %c0_81] : memref<8x8x64xf32, #tpu.memory_space<vmem>>, vector<1x8x64xf32>
    %251 = vector.shape_cast %250 : vector<1x8x64xf32> to vector<8x64xf32>
    %252 = vector.shape_cast %249 : vector<8x64xf32> to vector<1x8x64xf32>
    tpu.vector_store %arg10[%c7, %c0_80, %c0_81], %252 {strides = array<i32>} : memref<8x8x64xf32, #tpu.memory_space<vmem>>, vector<1x8x64xf32>,
    return
  }
  func.func @transform_0(%arg0: i32) -> (i32, i32) {
    %c0_i32 = arith.constant 0 : i32
    %c0_i32_0 = arith.constant 0 : i32
    %c0_i32_1 = arith.constant 0 : i32
    return %c0_i32, %c0_i32_0 : i32, i32
  }
  func.func @transform_1(%arg0: i32) -> (i32, i32) {
    %c0_i32 = arith.constant 0 : i32
    %c0_i32_0 = arith.constant 0 : i32
    %c0_i32_1 = arith.constant 0 : i32
    return %c0_i32, %c0_i32_0 : i32, i32
  }
  func.func @transform_2(%arg0: i32) -> (i32, i32) {
    %c0_i32 = arith.constant 0 : i32
    %c0_i32_0 = arith.constant 0 : i32
    %c0_i32_1 = arith.constant 0 : i32
    return %c0_i32, %c0_i32_0 : i32, i32
  }
  func.func @transform_3(%arg0: i32) -> (i32, i32) {
    %c0_i32 = arith.constant 0 : i32
    %c0_i32_0 = arith.constant 0 : i32
    %c0_i32_1 = arith.constant 0 : i32
    return %c0_i32, %c0_i32_0 : i32, i32
  }
  func.func @transform_4(%arg0: i32) -> (i32, i32) {
    %c0_i32 = arith.constant 0 : i32
    %c0_i32_0 = arith.constant 0 : i32
    %c0_i32_1 = arith.constant 0 : i32
    return %c0_i32, %c0_i32_0 : i32, i32
  }
  func.func @transform_5(%arg0: i32) -> (i32, i32) {
    %c0_i32 = arith.constant 0 : i32
    %c0_i32_0 = arith.constant 0 : i32
    %c0_i32_1 = arith.constant 0 : i32
    return %c0_i32, %c0_i32_0 : i32, i32
  }
  func.func @transform_6(%arg0: i32) -> (i32, i32) {
    %c0_i32 = arith.constant 0 : i32
    %c0_i32_0 = arith.constant 0 : i32
    %c0_i32_1 = arith.constant 0 : i32
    return %c0_i32, %c0_i32_0 : i32, i32
  }
  func.func @transform_7(%arg0: i32) -> (i32, i32) {
    %c0_i32 = arith.constant 0 : i32
    %c0_i32_0 = arith.constant 0 : i32
    %c0_i32_1 = arith.constant 0 : i32
    return %c0_i32, %c0_i32_0 : i32, i32
  }
  func.func @transform_8(%arg0: i32) -> (i32, i32) {
    %c0_i32 = arith.constant 0 : i32
    %c0_i32_0 = arith.constant 0 : i32
    %c0_i32_1 = arith.constant 0 : i32
    return %c0_i32, %c0_i32_0 : i32, i32
  }
  func.func @transform_9(%arg0: i32) -> (i32, i32, i32) {
    %c0_i32 = arith.constant 0 : i32
    %c0_i32_0 = arith.constant 0 : i32
    %c0_i32_1 = arith.constant 0 : i32
    %c0_i32_2 = arith.constant 0 : i32
    return %c0_i32, %c0_i32_0, %c0_i32_1 : i32, i32, i32
  }
}

</mosaic_0001>

<bundles_post_ra>
// kernel: tpu_custom_call.1
= control target key start
LH: loop header
LB: loop body
LE: loop exit
PB: predicated region body
PF: predicated region fallthrough
CT: control target
= control target key end

     0   :  { %14 = vsyncpa [#allocation3], 0  ;;  %s2146_s0 = inlined_call_operand.vmem [shape: f32[64,32], index: 0, kind: input, shape index: {}]   ;;  %s2147_s1 = inlined_call_operand.hbm [shape: f32[8,64], index: 1, kind: input, shape index: {}]   ;;  %s2148_s2 = inlined_call_operand.vmem [shape: f32[32,64], index: 2, kind: input, shape index: {}]   ;;  %s2149_s3 = inlined_call_operand.hbm [shape: f32[32,64], index: 3, kind: input, shape index: {}]   ;;  %s2150_s4 = inlined_call_operand.hbm [shape: f32[32,64], index: 4, kind: input, shape index: {}]   ;;  %s2151_s5 = inlined_call_operand.vmem [shape: f32[64,64], index: 5, kind: input, shape index: {}]   ;;  %s2152_s6 = inlined_call_operand.hbm [shape: f32[64,64], index: 6, kind: input, shape index: {}]   ;;  %s2153_s7 = inlined_call_operand.hbm [shape: f32[64,64], index: 7, kind: input, shape index: {}]   ;;  %s2154_s8 = inlined_call_operand.vmem [shape: f32[4,64], index: 8, kind: input, shape index: {}]   ;;  %s2155_s9 = inlined_call_operand.hbm [shape: f32[8,8,64], index: 9, kind: output, shape index: {}]  }
   0x1   :  { %15 = vsyncpa [#allocation6], 0 }
   0x2   :  { %16 = vsyncpa [#allocation9], 0  ;;  %s37_s11 = sshll.u32 %s2149_s3, 4  ;;  %s38_s11 = int_to_ptr.hbm [resolvable:$true] %s37_s11 }
   0x3   :  { %17 = vsyncpa [#allocation4], 0  ;;  %s1539_s12 = smov [#allocation5]   ;;  %s65_s16 = sshll.u32 %s2152_s6, 4  ;;  %s66_s16 = int_to_ptr.hbm [resolvable:$true] %s65_s16 }
   0x4   :  { %s39_s13 = sshll.u32 %s1539_s12, 4  ;;  %s1540_s17 = smov 128   ;;  %s40_s13 = int_to_ptr.vmem [resolvable:$true] %s39_s13 }
   0x5   :  { %s1541_s18 = smov 8   ;;  %s1542_s19 = smov [#allocation8]  }
   0x6   :  { %45 = dma.hbm_to_vmem [thread:$0]  %s38_s11, 512, %s40_s13, [#allocation6], %s1540_s17, %s1540_s17, %s1541_s18  }
   0x7   :  { %s67_s20 = sshll.u32 %s1542_s19, 4  ;;  %s25_s22 = sshll.u32 %s2147_s1, 4  ;;  %s68_s20 = int_to_ptr.vmem [resolvable:$true] %s67_s20  ;;  %s26_s22 = int_to_ptr.hbm [resolvable:$true] %s25_s22 }
   0x8   :  { %73 = dma.hbm_to_vmem [thread:$0]  %s66_s16, 1024, %s68_s20, [#allocation9], %s1540_s17, %s1540_s17, %s1541_s18  }
   0x9   :  { %s50_s24 = sshll.u32 %s2150_s4, 4  ;;  %s1543_s25 = smov [#allocation2]   ;;  %s51_s24 = int_to_ptr.hbm [resolvable:$true] %s50_s24 }
   0xa   :  { %s27_s26 = sshll.u32 %s1543_s25, 4  ;;  %s1544_s27 = smov [#allocation7]   ;;  %s28_s26 = int_to_ptr.vmem [resolvable:$true] %s27_s26 }
   0xb   :  { %30 = dma.hbm_to_vmem [thread:$0]  %s26_s22, 128, %s28_s26, [#allocation3]  }
   0xc   :  { %s52_s28 = sshll.u32 %s1544_s27, 4  ;;  %s78_s1 = sshll.u32 %s2153_s7, 4  ;;  %s53_s28 = int_to_ptr.vmem [resolvable:$true] %s52_s28  ;;  %s79_s1 = int_to_ptr.hbm [resolvable:$true] %s78_s1 }
   0xd   :  { %58 = dma.hbm_to_vmem [thread:$0]  %s51_s24, 512, %s53_s28, [#allocation6], %s1540_s17, %s1540_s17, %s1541_s18  }
   0xe   :  { %s1545_s10 = smov [#allocation10]  }
   0xf   :  { %s80_s11 = sshll.u32 %s1545_s10, 4  ;;  %s81_s11 = int_to_ptr.vmem [resolvable:$true] %s80_s11 }
  0x10   :  { %86 = dma.hbm_to_vmem [thread:$0]  %s79_s1, 1024, %s81_s11, [#allocation9], %s1540_s17, %s1540_s17, %s1541_s18  }
  0x11   :  { %1531 = dma.done.wait [#allocation3], 128  }
  0x12   :  { %1532 = vsyncadd [#allocation3], 4294967168 }
  0x13   :  { %1533 = dma.done.wait [#allocation6], 1024  }
  0x14   :  { %1534 = vsyncadd [#allocation6], 4294966272 }
  0x15   :  { %1535 = dma.done.wait [#allocation9], 2048  }
  0x16   :  { %1536 = vsyncadd [#allocation9], 4294965248  ;;  %v1627_v0 = vld [vmem:[%s2151_s5 + $0x38] sm:$0xff]  ;;  %v1632_v1 = vld [vmem:[%s2151_s5 + $0x30] sm:$0xff]  ;;  %vm126_vm0 = vcmask 261120   ;;  %vm309_vm1 = vcmask 523264  }
  0x17   :  { %321 = vmatpush.msra.mxu3 %v1627_v0  ;;  %v1638_v2 = vld [vmem:[%s2151_s5 + $0x28] sm:$0xff]  ;;  %v124_v3 = vld [vmem:[%s2148_s2 + $0x18] sm:$0xff]  ;;  %v123_v4 = vld [vmem:[%s2148_s2 + $0x10] sm:$0xff]  ;;  %s1204_s23 = sshll.u32 %s2155_s9, 4  ;;  %s1205_s23 = int_to_ptr.hbm [resolvable:$true] %s1204_s23 }
  0x18   :  { %163 = vmatpush.msra.mxu0 %v124_v3  ;;  %v1650_v5 = vld [vmem:[%s2151_s5 + $0x20] sm:$0xff]  ;;  %v122_v6 = vld [vmem:[%s2148_s2 + $0x8] sm:$0xff]  ;;  %v1659_v7 = vld [vmem:[%s2151_s5 + $0x18] sm:$0xff] }
  0x19   :  { %322 = vmatpush.msra.mxu3 %v1632_v1  ;;  %v121_v8 = vld [vmem:[%s2148_s2] sm:$0xff]  ;;  %v194_v11 = vld [vmem:[#allocation5 + $0x10] sm:$0xff]  ;;  %v1671_v12 = vld [vmem:[%s2151_s5 + $0x10] sm:$0xff] }
  0x1a   :  { %164 = vmatpush.msra.mxu0 %v123_v4  ;;  %v195_v9 = vld [vmem:[#allocation5 + $0x18] sm:$0xff]  ;;  %v1677_v13 = vld [vmem:[%s2151_s5 + $0x8] sm:$0xff]  ;;  %v193_v14 = vld [vmem:[#allocation5 + $0x8] sm:$0xff] }
  0x1b   :  { %323 = vmatpush.msra.mxu3 %v1638_v2  ;;  %v109_v10 = vld [vmem:[%s2146_s0] sm:$0xff]  ;;  %209 = vmatpush.msra.mxu1 %v195_v9  ;;  %v192_v18 = vld [vmem:[#allocation5] sm:$0xff]  ;;  %v240_v19 = vld [vmem:[#allocation7 + $0x10] sm:$0xff] }
  0x1c   :  { %165 = vmatpush.msra.mxu0 %v122_v6  ;;  %v1682_v15 = vld [vmem:[%s2151_s5] sm:$0xff]  ;;  %v1692_v21 = vld [vmem:[#allocation8 + $0x30] sm:$0xff]  ;;  %v239_v22 = vld [vmem:[#allocation7 + $0x8] sm:$0xff] }
  0x1d   :  { %324 = vmatpush.msra.mxu3 %v1650_v5  ;;  %v1684_v16 = vld [vmem:[#allocation8 + $0x38] sm:$0xff]  ;;  %210 = vmatpush.msra.mxu1 %v194_v11  ;;  %v238_v24 = vld [vmem:[#allocation7] sm:$0xff]  ;;  %v1706_v26 = vld [vmem:[#allocation8 + $0x28] sm:$0xff] }
  0x1e   :  { %166 = vmatpush.msra.mxu0 %v121_v8  ;;  %v241_v17 = vld [vmem:[#allocation7 + $0x18] sm:$0xff]  ;;  %v110_v25 = vld [vmem:[%s2146_s0 + $0x8] sm:$0xff]  ;;  %v1710_v27 = vld [vmem:[#allocation10 + $0x30] sm:$0xff] }
  0x1f   :  { %325 = vmatpush.msra.mxu3 %v1659_v7  ;;  %1219 = vmatmul.msk.f32.vlgmr.msra.gmra.mxu0 %vm126_vm0, %v109_v10  ;;  %v1690_v20 = vld [vmem:[#allocation2] sm:$0xff]  ;;  %v1713_v28 = vld [vmem:[#allocation8 + $0x20] sm:$0xff]  ;;  %v1718_v29 = vld [vmem:[#allocation10 + $0x28] sm:$0xff] }
  0x20   :  { %255 = vmatpush.msra.mxu2 %v241_v17  ;;  %211 = vmatpush.msra.mxu1 %v193_v14  ;;  %v1699_v23 = vld [vmem:[#allocation10 + $0x38] sm:$0xff]  ;;  %v1726_v31 = vld [vmem:[#allocation10 + $0x20] sm:$0xff]  ;;  %v1729_v32 = vld [vmem:[#allocation8 + $0x10] sm:$0xff] }
  0x21   :  { %326 = vmatpush.msra.mxu3 %v1671_v12  ;;  %452 = vmatpush.msrb.mxu0 %v1684_v16  ;;  %v1721_v30 = vld [vmem:[#allocation8 + $0x18] sm:$0xff]  ;;  %v1737_v34 = vld [vmem:[#allocation8 + $0x8] sm:$0xff]  ;;  %v1742_v35 = vld [vmem:[#allocation10 + $0x10] sm:$0xff] }
  0x22   :  { %256 = vmatpush.msra.mxu2 %v240_v19  ;;  %212 = vmatpush.msra.mxu1 %v192_v18  ;;  %v1734_v33 = vld [vmem:[#allocation10 + $0x18] sm:$0xff]  ;;  %v1745_v36 = vld [vmem:[#allocation8] sm:$0xff]  ;;  %v1750_v37 = vld [vmem:[#allocation10 + $0x8] sm:$0xff] }
  0x23   :  { %327 = vmatpush.msra.mxu3 %v1677_v13  ;;  %453 = vmatpush.msrb.mxu0 %v1692_v21  ;;  %v1756_v38 = vld [vmem:[#allocation10] sm:$0xff]  ;;  %v111_v39 = vld [vmem:[%s2146_s0 + $0x10] sm:$0xff]  ;;  %v112_v40 = vld [vmem:[%s2146_s0 + $0x18] sm:$0xff] }
  0x24   :  { %1227 = vmatmul.msk.f32.vlgmr.msra.gmra.mxu1 %vm126_vm0, %v109_v10  ;;  %257 = vmatpush.msra.mxu2 %v239_v22  ;;  %v113_v41 = vld [vmem:[%s2146_s0 + $0x20] sm:$0xff]  ;;  %v114_v44 = vld [vmem:[%s2146_s0 + $0x28] sm:$0xff]  ;;  %v115_v49 = vld [vmem:[%s2146_s0 + $0x30] sm:$0xff] }
  0x25   :  { %328 = vmatpush.msra.mxu3 %v1682_v15  ;;  %472 = vmatpush.msrb.mxu1 %v1699_v23  ;;  %v1837_v42 = vld [vmem:[%s2154_s8] ss:$0 sm:$0xff]  ;;  %v1855_v50 = vld [vmem:[%s2154_s8 + $0x1] ss:$0 sm:$0xff]  ;;  %v116_v53 = vld [vmem:[%s2146_s0 + $0x38] sm:$0xff] }
  0x26   :  { %1243 = vmatmul.msk.f32.vlgmr.msra.gmra.mxu3 %vm309_vm1, %v1690_v20  ;;  %258 = vmatpush.msra.mxu2 %v238_v24  ;;  %v1867_v8 = vld [vmem:[%s2154_s8 + $0x3] ss:$0 sm:$0xff] }
  0x27   :  { %341 = vmatpush.msrb.mxu3 %v1684_v16  ;;  %1220 = vmatmul.msk.f32.gmra.mxu0 %vm126_vm0, %v110_v25 }
  0x28   :  { %1235 = vmatmul.msk.f32.vlgmr.msra.gmra.mxu2 %vm126_vm0, %v109_v10  ;;  %454 = vmatpush.msrb.mxu0 %v1706_v26  ;;  %v1872_v10 = vld [vmem:[%s2154_s8 + $0x2] ss:$0 sm:$0xff] }
  0x29   :  { %342 = vmatpush.msrb.mxu3 %v1692_v21  ;;  %473 = vmatpush.msrb.mxu1 %v1710_v27 }
  0x2a   :  { %543 = vmatpush.msrb.mxu2 %v1627_v0  ;;  %455 = vmatpush.msrb.mxu0 %v1713_v28 }
  0x2b   :  { %343 = vmatpush.msrb.mxu3 %v1706_v26  ;;  %474 = vmatpush.msrb.mxu1 %v1718_v29 }
  0x2c   :  { %1228 = vmatmul.msk.f32.gmra.mxu1 %vm126_vm0, %v110_v25  ;;  %456 = vmatpush.msrb.mxu0 %v1721_v30 }
  0x2d   :  { %344 = vmatpush.msrb.mxu3 %v1713_v28  ;;  %475 = vmatpush.msrb.mxu1 %v1726_v31 }
  0x2e   :  { %544 = vmatpush.msrb.mxu2 %v1632_v1  ;;  %457 = vmatpush.msrb.mxu0 %v1729_v32 }
  0x2f   :  { %345 = vmatpush.msrb.mxu3 %v1721_v30  ;;  %476 = vmatpush.msrb.mxu1 %v1734_v33 }
  0x30   :  { %1236 = vmatmul.msk.f32.gmra.mxu2 %vm126_vm0, %v110_v25  ;;  %458 = vmatpush.msrb.mxu0 %v1737_v34 }
  0x31   :  { %346 = vmatpush.msrb.mxu3 %v1729_v32  ;;  %477 = vmatpush.msrb.mxu1 %v1742_v35 }
  0x32   :  { %545 = vmatpush.msrb.mxu2 %v1638_v2  ;;  %459 = vmatpush.msrb.mxu0 %v1745_v36 }
  0x33   :  { %347 = vmatpush.msrb.mxu3 %v1737_v34  ;;  %478 = vmatpush.msrb.mxu1 %v1750_v37 }
  0x34   :  { %546 = vmatpush.msrb.mxu2 %v1650_v5  ;;  %583 = vmatpush.msra.mxu0 %v1699_v23 }
  0x35   :  { %348 = vmatpush.msrb.mxu3 %v1745_v36  ;;  %479 = vmatpush.msrb.mxu1 %v1756_v38 }
  0x36   :  { %1244 = vmatmul.msk.f32.vlgmr.msrb.gmra.mxu3 %vm309_vm1, %v1690_v20  ;;  %547 = vmatpush.msrb.mxu2 %v1659_v7 }
  0x37   :  { %362 = vmatpush.msra.mxu3 %v1699_v23  ;;  %654 = vmatpush.msra.mxu1 %v1627_v0 }
  0x38   :  { %548 = vmatpush.msrb.mxu2 %v1671_v12  ;;  %584 = vmatpush.msra.mxu0 %v1710_v27 }
  0x39   :  { %363 = vmatpush.msra.mxu3 %v1710_v27  ;;  %655 = vmatpush.msra.mxu1 %v1632_v1 }
  0x3a   :  { %549 = vmatpush.msrb.mxu2 %v1677_v13  ;;  %585 = vmatpush.msra.mxu0 %v1718_v29 }
  0x3b   :  { %364 = vmatpush.msra.mxu3 %v1718_v29  ;;  %656 = vmatpush.msra.mxu1 %v1638_v2 }
  0x3c   :  { %550 = vmatpush.msrb.mxu2 %v1682_v15  ;;  %586 = vmatpush.msra.mxu0 %v1726_v31 }
  0x3d   :  { %365 = vmatpush.msra.mxu3 %v1726_v31  ;;  %657 = vmatpush.msra.mxu1 %v1650_v5 }
  0x3e   :  { %674 = vmatpush.msra.mxu2 %v1684_v16  ;;  %587 = vmatpush.msra.mxu0 %v1734_v33 }
  0x3f   :  { %366 = vmatpush.msra.mxu3 %v1734_v33  ;;  %658 = vmatpush.msra.mxu1 %v1659_v7 }
  0x40   :  { %675 = vmatpush.msra.mxu2 %v1692_v21  ;;  %588 = vmatpush.msra.mxu0 %v1742_v35 }
  0x41   :  { %367 = vmatpush.msra.mxu3 %v1742_v35  ;;  %659 = vmatpush.msra.mxu1 %v1671_v12 }
  0x42   :  { %676 = vmatpush.msra.mxu2 %v1706_v26  ;;  %589 = vmatpush.msra.mxu0 %v1750_v37 }
  0x43   :  { %368 = vmatpush.msra.mxu3 %v1750_v37  ;;  %660 = vmatpush.msra.mxu1 %v1677_v13 }
  0x44   :  { %677 = vmatpush.msra.mxu2 %v1713_v28  ;;  %590 = vmatpush.msra.mxu0 %v1756_v38 }
  0x45   :  { %369 = vmatpush.msra.mxu3 %v1756_v38  ;;  %661 = vmatpush.msra.mxu1 %v1682_v15 }
  0x46   :  { %1245 = vmatmul.msk.f32.vlgmr.msra.gmra.mxu3 %vm309_vm1, %v1690_v20  ;;  %678 = vmatpush.msra.mxu2 %v1721_v30 }
  0x47   :  { %432 = vmatpush.msrb.mxu3 %v1627_v0  ;;  %1221 = vmatmul.msk.f32.gmra.mxu0 %vm126_vm0, %v111_v39 }
  0x48   :  { %679 = vmatpush.msra.mxu2 %v1729_v32  ;;  %1229 = vmatmul.msk.f32.gmra.mxu1 %vm126_vm0, %v111_v39 }
  0x49   :  { %433 = vmatpush.msrb.mxu3 %v1632_v1  ;;  %1237 = vmatmul.msk.f32.gmra.mxu2 %vm126_vm0, %v111_v39 }
  0x4a   :  { %680 = vmatpush.msra.mxu2 %v1737_v34 }
  0x4b   :  { %434 = vmatpush.msrb.mxu3 %v1638_v2 }
  0x4c   :  { %681 = vmatpush.msra.mxu2 %v1745_v36 }
  0x4d   :  { %435 = vmatpush.msrb.mxu3 %v1650_v5 }
  0x4f   :  { %436 = vmatpush.msrb.mxu3 %v1659_v7  ;;  %1222 = vmatmul.msk.f32.gmra.mxu0 %vm126_vm0, %v112_v40 }
  0x50   :  { %1230 = vmatmul.msk.f32.gmra.mxu1 %vm126_vm0, %v112_v40 }
  0x51   :  { %437 = vmatpush.msrb.mxu3 %v1671_v12  ;;  %1238 = vmatmul.msk.f32.gmra.mxu2 %vm126_vm0, %v112_v40 }
  0x53   :  { %438 = vmatpush.msrb.mxu3 %v1677_v13 }
  0x55   :  { %439 = vmatpush.msrb.mxu3 %v1682_v15 }
  0x57   :  { %563 = vmatpush.msra.mxu3 %v1684_v16  ;;  %1223 = vmatmul.msk.f32.gmra.mxu0 %vm126_vm0, %v113_v41 }
  0x58   :  { %1231 = vmatmul.msk.f32.gmra.mxu1 %vm126_vm0, %v113_v41 }
  0x59   :  { %564 = vmatpush.msra.mxu3 %v1692_v21  ;;  %1239 = vmatmul.msk.f32.gmra.mxu2 %vm126_vm0, %v113_v41 }
  0x5b   :  { %565 = vmatpush.msra.mxu3 %v1706_v26 }
  0x5d   :  { %566 = vmatpush.msra.mxu3 %v1713_v28 }
  0x5f   :  { %567 = vmatpush.msra.mxu3 %v1721_v30  ;;  %1224 = vmatmul.msk.f32.gmra.mxu0 %vm126_vm0, %v114_v44 }
  0x60   :  { %1232 = vmatmul.msk.f32.gmra.mxu1 %vm126_vm0, %v114_v44 }
  0x61   :  { %568 = vmatpush.msra.mxu3 %v1729_v32  ;;  %1240 = vmatmul.msk.f32.gmra.mxu2 %vm126_vm0, %v114_v44 }
  0x63   :  { %569 = vmatpush.msra.mxu3 %v1737_v34 }
  0x65   :  { %570 = vmatpush.msra.mxu3 %v1745_v36 }
  0x67   :  { %1225 = vmatmul.msk.f32.gmra.mxu0 %vm126_vm0, %v115_v49 }
  0x68   :  { %1233 = vmatmul.msk.f32.gmra.mxu1 %vm126_vm0, %v115_v49 }
  0x69   :  { %1241 = vmatmul.msk.f32.gmra.mxu2 %vm126_vm0, %v115_v49 }
  0x6f   :  { %1226 = vmatmul.msk.f32.gmra.mxu0 %vm126_vm0, %v116_v53 }
  0x70   :  { %1234 = vmatmul.msk.f32.gmra.mxu1 %vm126_vm0, %v116_v53 }
  0x71   :  { %1242 = vmatmul.msk.f32.gmra.mxu2 %vm126_vm0, %v116_v53 }
  0x9c   :  { %v168_v43 = vpop.f32.mrf.mxu0 }
  0x9d   :  { %v169_v45 = vadd.f32 %v1837_v42, %v168_v43 }
  0xa1   :  { %v214_v51 = vpop.f32.mrf.mxu1 }
  0xa2   :  { %v215_v55 = vadd.f32 %v1855_v50, %v214_v51 }
  0xa9   :  { %v330_v46 = vpop.f32.mrf.mxu3 }
  0xaa   :  { %v374_v47 = vadd.f32 %v330_v46, %v169_v45 }
  0xab   :  { %v260_v11 = vpop.f32.mrf.mxu2 }
  0xac   :  { %v1246_v48 = vmul.f32 -1.442695, %v374_v47  ;;  %v261_v22 = vadd.f32 %v1872_v10, %v260_v11 }
  0xae   :  { %1295 = vpow2.f32 %v1246_v48 }
  0xb4   :  { %v1296_v52 = vpop.eup %1295 }
  0xb5   :  { %v378_v54 = vadd.f32 1.0, %v1296_v52 }
  0xb7   :  { %1297 = vrcp.f32 %v378_v54  ;;  %v390_v6 = vand.u32 2147483648, %v378_v54  ;;  %vm384_vm3 = vweird.f32 %v378_v54  ;;  %v388_v9 = vand.u32 2147483647, %v378_v54 }
  0xb9   :  { %v350_v56 = vpop.f32.mrf.mxu3  ;;  %v391_v18 = vor.u32 1.1754944e-38, %v390_v6  ;;  %vm389_vm5 = vcmp.eq.f32.partialorder %v388_v9, 8.507059e+37 }
  0xba   :  { %v394_v57 = vadd.f32 %v350_v56, %v215_v55 }
  0xbc   :  { %v1247_v58 = vmul.f32 -1.442695, %v394_v57 }
  0xbd   :  { %v1298_v59 = vpop.eup %1297 }
  0xbe   :  { %1299 = vpow2.f32 %v1247_v58  ;;  %v380_v60 = vmul.f32 %v1298_v59, %v378_v54  ;;  %vm385_vm2 = vweird.f32 %v1298_v59 }
  0xbf   :  { %vm386_vm4 = vmor %vm384_vm3, %vm385_vm2 }
  0xc0   :  { %v381_v61 = vsub.f32 1.0, %v380_v60 }
  0xc2   :  { %v382_v62 = vmul.f32 %v1298_v59, %v381_v61 }
  0xc4   :  { %v1300_v63 = vpop.eup %1299  ;;  %v383_v3 = vadd.f32 %v1298_v59, %v382_v62 }
  0xc5   :  { %v398_v4 = vadd.f32 1.0, %v1300_v63 }
  0xc6   :  { %v387_v14 = vsel %vm386_vm4, %v1298_v59, %v383_v3  ;;  %v217_v59 = vpop.f32.mrf.mxu1 }
  0xc7   :  { %1301 = vrcp.f32 %v398_v4  ;;  %v392_v24 = vsel %vm389_vm5, %v391_v18, %v387_v14  ;;  %v410_v44 = vand.u32 2147483648, %v398_v4  ;;  %v408_v46 = vand.u32 2147483647, %v398_v4 }
  0xc8   :  { %vm404_vm7 = vweird.f32 %v398_v4  ;;  %v218_v6 = vadd.f32 %v1855_v50, %v217_v59 }
  0xc9   :  { %v371_v17 = vpop.f32.mrf.mxu3  ;;  %v411_v48 = vor.u32 1.1754944e-38, %v410_v44  ;;  %vm409_vm9 = vcmp.eq.f32.partialorder %v408_v46, 8.507059e+37 }
  0xca   :  { %v372_v19 = vadd.f32 %v1867_v8, %v371_v17 }
  0xcc   :  { %v414_v25 = vmul.f32 %v392_v24, %v372_v19 }
  0xcd   :  { %v1302_v39 = vpop.eup %1301 }
  0xce   :  { %v400_v40 = vmul.f32 %v1302_v39, %v398_v4  ;;  %v415_v41 = vadd.f32 %v414_v25, %v261_v22  ;;  %vm405_vm6 = vweird.f32 %v1302_v39  ;;  %v1919_v61 = vpop.f32.mrf.mxu1 }
  0xcf   :  { %vm406_vm8 = vmor %vm404_vm7, %vm405_vm6 }
  0xd0   :  { %v401_v43 = vsub.f32 1.0, %v400_v40  ;;  %1303 = vtanh.f32 %v415_v41 }
  0xd2   :  { %v402_v45 = vmul.f32 %v1302_v39, %v401_v43 }
  0xd4   :  { %v403_v47 = vadd.f32 %v1302_v39, %v402_v45 }
  0xd6   :  { %v1304_v49 = vpop.eup %1303  ;;  %v407_v51 = vsel %vm406_vm8, %v1302_v39, %v403_v47  ;;  %v1923_v63 = vpop.f32.mrf.mxu1 }
  0xd7   :  { %v412_v52 = vsel %vm409_vm9, %v411_v48, %v407_v51  ;;  %v417_v53 = vsub.f32 %v1690_v20, %v1304_v49  ;;  %v171_v20 = vpop.f32.mrf.mxu0 }
  0xd8   :  { %v172_v18 = vadd.f32 %v1837_v42, %v171_v20  ;;  %v263_v20 = vpop.f32.mrf.mxu2 }
  0xd9   :  { %v418_v54 = vmul.f32 %v417_v53, %v412_v52 }
  0xdb   :  { %v1877_v55 = vadd.f32 %v1304_v49, %v418_v54 }
  0xdd   :  { %420 = vst.msk [vmem:[#allocation11] sm:$0xff] %vm309_vm1, %v1877_v55  ;;  %1248 = vmatmul.msk.f32.vlgmr.msrb.gmra.mxu3 %vm309_vm1, %v1877_v55  ;;  %1249 = vmatmul.msk.f32.vlgmr.msrb.gmra.mxu0 %vm309_vm1, %v1877_v55 }
  0xde   :  { %1250 = vmatmul.msk.f32.vlgmr.msrb.gmra.mxu1 %vm309_vm1, %v1877_v55  ;;  %694 = vmatpush.msrb.mxu3 %v1699_v23  ;;  %v1927_v4 = vpop.f32.mrf.mxu1 }
  0xdf   :  { %765 = vmatpush.msrb.mxu0 %v1627_v0  ;;  %785 = vmatpush.msrb.mxu1 %v1684_v16  ;;  %v1911_v56 = vpop.f32.mrf.mxu0 }
  0xe0   :  { %695 = vmatpush.msrb.mxu3 %v1710_v27 }
  0xe1   :  { %766 = vmatpush.msrb.mxu0 %v1632_v1  ;;  %786 = vmatpush.msrb.mxu1 %v1692_v21 }
  0xe2   :  { %696 = vmatpush.msrb.mxu3 %v1718_v29 }
  0xe3   :  { %767 = vmatpush.msrb.mxu0 %v1638_v2  ;;  %787 = vmatpush.msrb.mxu1 %v1706_v26 }
  0xe4   :  { %697 = vmatpush.msrb.mxu3 %v1726_v31 }
  0xe5   :  { %768 = vmatpush.msrb.mxu0 %v1650_v5  ;;  %788 = vmatpush.msrb.mxu1 %v1713_v28 }
  0xe6   :  { %698 = vmatpush.msrb.mxu3 %v1734_v33  ;;  %v1930_v14 = vpop.f32.mrf.mxu1 }
  0xe7   :  { %769 = vmatpush.msrb.mxu0 %v1659_v7  ;;  %789 = vmatpush.msrb.mxu1 %v1721_v30  ;;  %v1913_v57 = vpop.f32.mrf.mxu0 }
  0xe8   :  { %699 = vmatpush.msrb.mxu3 %v1742_v35 }
  0xe9   :  { %770 = vmatpush.msrb.mxu0 %v1671_v12  ;;  %790 = vmatpush.msrb.mxu1 %v1729_v32 }
  0xea   :  { %700 = vmatpush.msrb.mxu3 %v1750_v37 }
  0xeb   :  { %771 = vmatpush.msrb.mxu0 %v1677_v13  ;;  %791 = vmatpush.msrb.mxu1 %v1737_v34 }
  0xec   :  { %701 = vmatpush.msrb.mxu3 %v1756_v38 }
  0xed   :  { %772 = vmatpush.msrb.mxu0 %v1682_v15  ;;  %792 = vmatpush.msrb.mxu1 %v1745_v36 }
  0xee   :  { %v1933_v25 = vpop.f32.mrf.mxu1 }
  0xef   :  { %v1915_v58 = vpop.f32.mrf.mxu0 }
  0xf6   :  { %v1935_v44 = vpop.f32.mrf.mxu1 }
  0xf7   :  { %v1917_v60 = vpop.f32.mrf.mxu0  ;;  %2156 = vst [vmem:[#allocation16_spill] sm:$0xff] %v1935_v44 }
  0xff   :  { %v1921_v62 = vpop.f32.mrf.mxu0 }
 0x107   :  { %v1925_v3 = vpop.f32.mrf.mxu0 }
 0x15a   :  { %v461_v9 = vpop.f32.mrf.mxu0 }
 0x15b   :  { %v504_v11 = vadd.f32 %v461_v9, %v218_v6  ;;  %v481_v54 = vpop.f32.mrf.mxu1 }
 0x15d   :  { %v1252_v17 = vmul.f32 -1.442695, %v504_v11  ;;  %v482_v11 = vadd.f32 %v1867_v8, %v481_v54 }
 0x15f   :  { %1305 = vpow2.f32 %v1252_v17  ;;  %v264_v17 = vadd.f32 %v1872_v10, %v263_v20 }
 0x160   :  { %v441_v19 = vpop.f32.mrf.mxu3 }
 0x161   :  { %v484_v22 = vadd.f32 %v441_v19, %v172_v18 }
 0x163   :  { %v1251_v24 = vmul.f32 -1.442695, %v484_v22 }
 0x165   :  { %1307 = vpow2.f32 %v1251_v24  ;;  %v1306_v39 = vpop.eup %1305 }
 0x166   :  { %v508_v41 = vadd.f32 1.0, %v1306_v39 }
 0x168   :  { %vm514_vm15 = vweird.f32 %v508_v41 }
 0x16b   :  { %v1308_v40 = vpop.eup %1307 }
 0x16c   :  { %v488_v43 = vadd.f32 1.0, %v1308_v40 }
 0x16e   :  { %1309 = vrcp.f32 %v488_v43  ;;  %v500_v51 = vand.u32 2147483648, %v488_v43  ;;  %v498_v53 = vand.u32 2147483647, %v488_v43  ;;  %vm494_vm11 = vweird.f32 %v488_v43 }
 0x16f   :  { %1311 = vrcp.f32 %v508_v41 }
 0x170   :  { %v501_v9 = vor.u32 1.1754944e-38, %v500_v51  ;;  %vm499_vm13 = vcmp.eq.f32.partialorder %v498_v53, 8.507059e+37 }
 0x174   :  { %v1310_v45 = vpop.eup %1309 }
 0x175   :  { %v1312_v46 = vpop.eup %1311  ;;  %v490_v47 = vmul.f32 %v1310_v45, %v488_v43  ;;  %vm495_vm10 = vweird.f32 %v1310_v45 }
 0x176   :  { %v510_v49 = vmul.f32 %v1312_v46, %v508_v41  ;;  %vm496_vm12 = vmor %vm494_vm11, %vm495_vm10  ;;  %vm515_vm14 = vweird.f32 %v1312_v46 }
 0x177   :  { %v491_v48 = vsub.f32 1.0, %v490_v47  ;;  %v520_v47 = vand.u32 2147483648, %v508_v41  ;;  %vm516_vm0 = vmor %vm514_vm15, %vm515_vm14 }
 0x178   :  { %v511_v6 = vsub.f32 1.0, %v510_v49 }
 0x179   :  { %v492_v52 = vmul.f32 %v1310_v45, %v491_v48  ;;  %v518_v48 = vand.u32 2147483647, %v508_v41  ;;  %v521_v51 = vor.u32 1.1754944e-38, %v520_v47 }
 0x17a   :  { %v512_v24 = vmul.f32 %v1312_v46, %v511_v6 }
 0x17b   :  { %v493_v59 = vadd.f32 %v1310_v45, %v492_v52  ;;  %vm519_vm2 = vcmp.eq.f32.partialorder %v518_v48, 8.507059e+37 }
 0x17c   :  { %v513_v40 = vadd.f32 %v1312_v46, %v512_v24 }
 0x17d   :  { %v497_v18 = vsel %vm496_vm12, %v1310_v45, %v493_v59 }
 0x17e   :  { %v502_v19 = vsel %vm499_vm13, %v501_v9, %v497_v18  ;;  %v517_v43 = vsel %vm516_vm0, %v1312_v46, %v513_v40  ;;  %v175_v9 = vadd.f32 %v1837_v42, %v1911_v56 }
 0x17f   :  { %v524_v22 = vmul.f32 %v502_v19, %v482_v11  ;;  %v522_v54 = vsel %vm519_vm2, %v521_v51, %v517_v43  ;;  %v221_v11 = vadd.f32 %v1855_v50, %v1919_v61 }
 0x181   :  { %v525_v39 = vadd.f32 %v524_v22, %v264_v17 }
 0x183   :  { %1313 = vtanh.f32 %v525_v39 }
 0x189   :  { %v1314_v49 = vpop.eup %1313 }
 0x18a   :  { %v527_v52 = vsub.f32 %v1877_v55, %v1314_v49  ;;  %v266_v55 = vpop.f32.mrf.mxu2 }
 0x18c   :  { %v528_v45 = vmul.f32 %v527_v52, %v522_v54 }
 0x18e   :  { %v1940_v53 = vadd.f32 %v1314_v49, %v528_v45 }
 0x190   :  { %531 = vst.msk [vmem:[#allocation11 + $0x8] sm:$0xff] %vm309_vm1, %v1940_v53  ;;  %1253 = vmatmul.msk.f32.vlgmr.msrb.gmra.mxu2 %vm309_vm1, %v1940_v53  ;;  %1254 = vmatmul.msk.f32.vlgmr.msra.gmra.mxu3 %vm309_vm1, %v1940_v53 }
 0x191   :  { %1255 = vmatmul.msk.f32.vlgmr.msra.gmra.mxu0 %vm309_vm1, %v1940_v53  ;;  %805 = vmatpush.msrb.mxu2 %v1699_v23 }
 0x192   :  { %876 = vmatpush.msra.mxu3 %v1627_v0  ;;  %896 = vmatpush.msra.mxu0 %v1684_v16  ;;  %v1974_v41 = vpop.f32.mrf.mxu2 }
 0x193   :  { %806 = vmatpush.msrb.mxu2 %v1710_v27 }
 0x194   :  { %877 = vmatpush.msra.mxu3 %v1632_v1  ;;  %897 = vmatpush.msra.mxu0 %v1692_v21 }
 0x195   :  { %807 = vmatpush.msrb.mxu2 %v1718_v29 }
 0x196   :  { %878 = vmatpush.msra.mxu3 %v1638_v2  ;;  %898 = vmatpush.msra.mxu0 %v1706_v26 }
 0x197   :  { %808 = vmatpush.msrb.mxu2 %v1726_v31 }
 0x198   :  { %879 = vmatpush.msra.mxu3 %v1650_v5  ;;  %899 = vmatpush.msra.mxu0 %v1713_v28 }
 0x199   :  { %809 = vmatpush.msrb.mxu2 %v1734_v33 }
 0x19a   :  { %880 = vmatpush.msra.mxu3 %v1659_v7  ;;  %900 = vmatpush.msra.mxu0 %v1721_v30  ;;  %v1976_v46 = vpop.f32.mrf.mxu2 }
 0x19b   :  { %810 = vmatpush.msrb.mxu2 %v1742_v35 }
 0x19c   :  { %881 = vmatpush.msra.mxu3 %v1671_v12  ;;  %901 = vmatpush.msra.mxu0 %v1729_v32 }
 0x19d   :  { %811 = vmatpush.msrb.mxu2 %v1750_v37 }
 0x19e   :  { %882 = vmatpush.msra.mxu3 %v1677_v13  ;;  %902 = vmatpush.msra.mxu0 %v1737_v34 }
 0x19f   :  { %812 = vmatpush.msrb.mxu2 %v1756_v38 }
 0x1a0   :  { %883 = vmatpush.msra.mxu3 %v1682_v15  ;;  %903 = vmatpush.msra.mxu0 %v1745_v36 }
 0x1a2   :  { %v1978_v20 = vpop.f32.mrf.mxu2 }
 0x1aa   :  { %v1980_v59 = vpop.f32.mrf.mxu2 }
 0x1b2   :  { %v1982_v6 = vpop.f32.mrf.mxu2 }
 0x1b3   :  { %2157 = vst [vmem:[#allocation17_spill] sm:$0xff] %v1982_v6 }
 0x213   :  { %v552_v17 = vpop.f32.mrf.mxu2  ;;  %v572_v18 = vpop.f32.mrf.mxu3 }
 0x214   :  { %v595_v19 = vadd.f32 %v552_v17, %v175_v9  ;;  %v615_v22 = vadd.f32 %v572_v18, %v221_v11  ;;  %v592_v11 = vpop.f32.mrf.mxu0 }
 0x216   :  { %v1256_v24 = vmul.f32 -1.442695, %v595_v19  ;;  %v1257_v39 = vmul.f32 -1.442695, %v615_v22  ;;  %v593_v22 = vadd.f32 %v1867_v8, %v592_v11 }
 0x218   :  { %1315 = vpow2.f32 %v1256_v24 }
 0x219   :  { %1317 = vpow2.f32 %v1257_v39 }
 0x21e   :  { %v1316_v40 = vpop.eup %1315 }
 0x21f   :  { %v1318_v47 = vpop.eup %1317  ;;  %v599_v48 = vadd.f32 1.0, %v1316_v40  ;;  %v267_v40 = vadd.f32 %v1872_v10, %v266_v55 }
 0x220   :  { %v619_v43 = vadd.f32 1.0, %v1318_v47 }
 0x221   :  { %1319 = vrcp.f32 %v599_v48  ;;  %v611_v54 = vand.u32 2147483648, %v599_v48  ;;  %v609_v9 = vand.u32 2147483647, %v599_v48  ;;  %vm605_vm4 = vweird.f32 %v599_v48 }
 0x222   :  { %1321 = vrcp.f32 %v619_v43  ;;  %v631_v44 = vand.u32 2147483648, %v619_v43  ;;  %vm625_vm8 = vweird.f32 %v619_v43 }
 0x223   :  { %v612_v18 = vor.u32 1.1754944e-38, %v611_v54  ;;  %vm610_vm6 = vcmp.eq.f32.partialorder %v609_v9, 8.507059e+37 }
 0x227   :  { %v1320_v49 = vpop.eup %1319 }
 0x228   :  { %v1322_v51 = vpop.eup %1321  ;;  %v601_v56 = vmul.f32 %v1320_v49, %v599_v48  ;;  %vm606_vm3 = vweird.f32 %v1320_v49 }
 0x229   :  { %v621_v61 = vmul.f32 %v1322_v51, %v619_v43  ;;  %vm607_vm5 = vmor %vm605_vm4, %vm606_vm3  ;;  %vm626_vm7 = vweird.f32 %v1322_v51 }
 0x22a   :  { %v602_v52 = vsub.f32 1.0, %v601_v56  ;;  %vm627_vm9 = vmor %vm625_vm8, %vm626_vm7 }
 0x22b   :  { %v622_v19 = vsub.f32 1.0, %v621_v61  ;;  %v632_v61 = vor.u32 1.1754944e-38, %v631_v44 }
 0x22c   :  { %v603_v45 = vmul.f32 %v1320_v49, %v602_v52 }
 0x22d   :  { %v623_v56 = vmul.f32 %v1322_v51, %v622_v19 }
 0x22e   :  { %v604_v17 = vadd.f32 %v1320_v49, %v603_v45  ;;  %v629_v45 = vand.u32 2147483647, %v619_v43 }
 0x22f   :  { %v624_v52 = vadd.f32 %v1322_v51, %v623_v56 }
 0x230   :  { %v608_v24 = vsel %vm607_vm5, %v1320_v49, %v604_v17  ;;  %vm630_vm10 = vcmp.eq.f32.partialorder %v629_v45, 8.507059e+37 }
 0x231   :  { %v613_v39 = vsel %vm610_vm6, %v612_v18, %v608_v24  ;;  %v628_v48 = vsel %vm627_vm9, %v1322_v51, %v624_v52 }
 0x232   :  { %v635_v47 = vmul.f32 %v613_v39, %v593_v22  ;;  %v633_v9 = vsel %vm630_vm10, %v632_v61, %v628_v48 }
 0x234   :  { %v636_v6 = vadd.f32 %v635_v47, %v267_v40 }
 0x236   :  { %1323 = vtanh.f32 %v636_v6 }
 0x23c   :  { %v1324_v54 = vpop.eup %1323 }
 0x23d   :  { %v638_v49 = vsub.f32 %v1940_v53, %v1324_v54  ;;  %v224_v53 = vadd.f32 %v1855_v50, %v1923_v63 }
 0x23f   :  { %v639_v11 = vmul.f32 %v638_v49, %v633_v9 }
 0x241   :  { %v1991_v17 = vadd.f32 %v1324_v54, %v639_v11 }
 0x243   :  { %642 = vst.msk [vmem:[#allocation11 + $0x10] sm:$0xff] %vm309_vm1, %v1991_v17  ;;  %1258 = vmatmul.msk.f32.vlgmr.msra.gmra.mxu1 %vm309_vm1, %v1991_v17  ;;  %1259 = vmatmul.msk.f32.vlgmr.msra.gmra.mxu2 %vm309_vm1, %v1991_v17 }
 0x244   :  { %1260 = vmatmul.msk.f32.vlgmr.msrb.gmra.mxu3 %vm309_vm1, %v1991_v17  ;;  %916 = vmatpush.msra.mxu1 %v1699_v23 }
 0x245   :  { %987 = vmatpush.msra.mxu2 %v1627_v0  ;;  %1007 = vmatpush.msrb.mxu3 %v1684_v16 }
 0x246   :  { %917 = vmatpush.msra.mxu1 %v1710_v27 }
 0x247   :  { %988 = vmatpush.msra.mxu2 %v1632_v1  ;;  %1008 = vmatpush.msrb.mxu3 %v1692_v21  ;;  %v178_v1 = vadd.f32 %v1837_v42, %v1913_v57 }
 0x248   :  { %918 = vmatpush.msra.mxu1 %v1718_v29 }
 0x249   :  { %989 = vmatpush.msra.mxu2 %v1638_v2  ;;  %1009 = vmatpush.msrb.mxu3 %v1706_v26 }
 0x24a   :  { %919 = vmatpush.msra.mxu1 %v1726_v31 }
 0x24b   :  { %990 = vmatpush.msra.mxu2 %v1650_v5  ;;  %1010 = vmatpush.msrb.mxu3 %v1713_v28 }
 0x24c   :  { %920 = vmatpush.msra.mxu1 %v1734_v33 }
 0x24d   :  { %991 = vmatpush.msra.mxu2 %v1659_v7  ;;  %1011 = vmatpush.msrb.mxu3 %v1721_v30 }
 0x24e   :  { %921 = vmatpush.msra.mxu1 %v1742_v35 }
 0x24f   :  { %992 = vmatpush.msra.mxu2 %v1671_v12  ;;  %1012 = vmatpush.msrb.mxu3 %v1729_v32 }
 0x250   :  { %922 = vmatpush.msra.mxu1 %v1750_v37 }
 0x251   :  { %993 = vmatpush.msra.mxu2 %v1677_v13  ;;  %1013 = vmatpush.msrb.mxu3 %v1737_v34 }
 0x252   :  { %923 = vmatpush.msra.mxu1 %v1756_v38 }
 0x253   :  { %994 = vmatpush.msra.mxu2 %v1682_v15  ;;  %1014 = vmatpush.msrb.mxu3 %v1745_v36 }
 0x2c0   :  { %v663_v2 = vpop.f32.mrf.mxu1 }
 0x2c1   :  { %v706_v5 = vadd.f32 %v663_v2, %v178_v1  ;;  %v270_v1 = vadd.f32 %v1872_v10, %v1974_v41  ;;  %v1375_v41 = vld [vmem:[%s2151_s5 + $0x30] sm:$0xff] }
 0x2c3   :  { %v1261_v44 = vmul.f32 -1.442695, %v706_v5 }
 0x2c5   :  { %1325 = vpow2.f32 %v1261_v44 }
 0x2c6   :  { %v683_v55 = vpop.f32.mrf.mxu2 }
 0x2c7   :  { %v726_v6 = vadd.f32 %v683_v55, %v224_v53  ;;  %v703_v63 = vpop.f32.mrf.mxu3 }
 0x2c8   :  { %v704_v49 = vadd.f32 %v1867_v8, %v703_v63 }
 0x2c9   :  { %v1262_v43 = vmul.f32 -1.442695, %v726_v6 }
 0x2cb   :  { %v1326_v51 = vpop.eup %1325  ;;  %1327 = vpow2.f32 %v1262_v43 }
 0x2cc   :  { %v710_v18 = vadd.f32 1.0, %v1326_v51 }
 0x2ce   :  { %1329 = vrcp.f32 %v710_v18  ;;  %v722_v40 = vand.u32 2147483648, %v710_v18  ;;  %v720_v56 = vand.u32 2147483647, %v710_v18  ;;  %vm716_vm12 = vweird.f32 %v710_v18 }
 0x2d0   :  { %v723_v54 = vor.u32 1.1754944e-38, %v722_v40  ;;  %vm721_vm14 = vcmp.eq.f32.partialorder %v720_v56, 8.507059e+37 }
 0x2d1   :  { %v1328_v19 = vpop.eup %1327 }
 0x2d2   :  { %v730_v22 = vadd.f32 1.0, %v1328_v19 }
 0x2d4   :  { %v1330_v24 = vpop.eup %1329  ;;  %1331 = vrcp.f32 %v730_v22  ;;  %v742_v55 = vand.u32 2147483648, %v730_v22  ;;  %vm736_vm0 = vweird.f32 %v730_v22  ;;  %v740_v6 = vand.u32 2147483647, %v730_v22 }
 0x2d5   :  { %v712_v39 = vmul.f32 %v1330_v24, %v710_v18  ;;  %vm717_vm11 = vweird.f32 %v1330_v24 }
 0x2d6   :  { %vm718_vm13 = vmor %vm716_vm12, %vm717_vm11  ;;  %v743_v18 = vor.u32 1.1754944e-38, %v742_v55  ;;  %vm741_vm3 = vcmp.eq.f32.partialorder %v740_v6, 8.507059e+37 }
 0x2d7   :  { %v713_v57 = vsub.f32 1.0, %v712_v39 }
 0x2d9   :  { %v714_v47 = vmul.f32 %v1330_v24, %v713_v57 }
 0x2da   :  { %v1332_v52 = vpop.eup %1331 }
 0x2db   :  { %v732_v45 = vmul.f32 %v1332_v52, %v730_v22  ;;  %v715_v48 = vadd.f32 %v1330_v24, %v714_v47  ;;  %vm737_vm15 = vweird.f32 %v1332_v52 }
 0x2dc   :  { %vm738_vm2 = vmor %vm736_vm0, %vm737_vm15 }
 0x2dd   :  { %v733_v61 = vsub.f32 1.0, %v732_v45  ;;  %v719_v9 = vsel %vm718_vm13, %v1330_v24, %v715_v48 }
 0x2de   :  { %v724_v11 = vsel %vm721_vm14, %v723_v54, %v719_v9  ;;  %v273_v54 = vadd.f32 %v1872_v10, %v1976_v46  ;;  %v1378_v46 = vld [vmem:[#allocation10 + $0x38] sm:$0xff] }
 0x2df   :  { %v746_v2 = vmul.f32 %v724_v11, %v704_v49  ;;  %v734_v5 = vmul.f32 %v1332_v52, %v733_v61 }
 0x2e1   :  { %v747_v44 = vadd.f32 %v746_v2, %v270_v1  ;;  %v735_v53 = vadd.f32 %v1332_v52, %v734_v5 }
 0x2e3   :  { %1333 = vtanh.f32 %v747_v44  ;;  %v739_v43 = vsel %vm738_vm2, %v1332_v52, %v735_v53 }
 0x2e4   :  { %v744_v24 = vsel %vm741_vm3, %v743_v18, %v739_v43  ;;  %v1379_v18 = vld [vmem:[#allocation10 + $0x30] sm:$0xff] }
 0x2e9   :  { %v1334_v51 = vpop.eup %1333 }
 0x2ea   :  { %v749_v19 = vsub.f32 %v1991_v17, %v1334_v51  ;;  %v1376_v17 = vld [vmem:[%s2151_s5 + $0x28] sm:$0xff] }
 0x2ec   :  { %v750_v39 = vmul.f32 %v749_v19, %v744_v24  ;;  %v1380_v19 = vld [vmem:[#allocation10 + $0x28] sm:$0xff]  ;;  %v1381_v24 = vld [vmem:[#allocation10 + $0x20] sm:$0xff] }
 0x2ee   :  { %v2033_v57 = vadd.f32 %v1334_v51, %v750_v39  ;;  %v1382_v39 = vld [vmem:[#allocation10 + $0x18] sm:$0xff] }
 0x2f0   :  { %753 = vst.msk [vmem:[#allocation11 + $0x18] sm:$0xff] %vm309_vm1, %v2033_v57  ;;  %1263 = vmatmul.msk.f32.vlgmr.msrb.gmra.mxu0 %vm309_vm1, %v2033_v57  ;;  %1264 = vmatmul.msk.f32.vlgmr.msrb.gmra.mxu1 %vm309_vm1, %v2033_v57 }
 0x2f1   :  { %1265 = vmatmul.msk.f32.vlgmr.msrb.gmra.mxu2 %vm309_vm1, %v2033_v57  ;;  %1027 = vmatpush.msrb.mxu0 %v1699_v23 }
 0x2f2   :  { %1098 = vmatpush.msrb.mxu1 %v1627_v0  ;;  %1118 = vmatpush.msrb.mxu2 %v1684_v16  ;;  %v1377_v0 = vld [vmem:[%s2151_s5 + $0x20] sm:$0xff] }
 0x2f3   :  { %1028 = vmatpush.msrb.mxu0 %v1710_v27 }
 0x2f4   :  { %1099 = vmatpush.msrb.mxu1 %v1375_v41  ;;  %1119 = vmatpush.msrb.mxu2 %v1692_v21 }
 0x2f5   :  { %1029 = vmatpush.msrb.mxu0 %v1718_v29 }
 0x2f6   :  { %1100 = vmatpush.msrb.mxu1 %v1376_v17  ;;  %1120 = vmatpush.msrb.mxu2 %v1706_v26 }
 0x2f7   :  { %1030 = vmatpush.msrb.mxu0 %v1726_v31 }
 0x2f8   :  { %1101 = vmatpush.msrb.mxu1 %v1377_v0  ;;  %1121 = vmatpush.msrb.mxu2 %v1713_v28 }
 0x2f9   :  { %1031 = vmatpush.msrb.mxu0 %v1734_v33 }
 0x2fa   :  { %1102 = vmatpush.msrb.mxu1 %v1659_v7  ;;  %1122 = vmatpush.msrb.mxu2 %v1721_v30  ;;  %v181_v7 = vadd.f32 %v1837_v42, %v1915_v58 }
 0x2fb   :  { %1032 = vmatpush.msrb.mxu0 %v1742_v35 }
 0x2fc   :  { %1103 = vmatpush.msrb.mxu1 %v1671_v12  ;;  %1123 = vmatpush.msrb.mxu2 %v1729_v32  ;;  %v227_v12 = vadd.f32 %v1855_v50, %v1927_v4 }
 0x2fd   :  { %1033 = vmatpush.msrb.mxu0 %v1750_v37 }
 0x2fe   :  { %1104 = vmatpush.msrb.mxu1 %v1677_v13  ;;  %1124 = vmatpush.msrb.mxu2 %v1737_v34 }
 0x2ff   :  { %1034 = vmatpush.msrb.mxu0 %v1756_v38 }
 0x300   :  { %1105 = vmatpush.msrb.mxu1 %v1682_v15  ;;  %1125 = vmatpush.msrb.mxu2 %v1745_v36 }
 0x36d   :  { %v774_v16 = vpop.f32.mrf.mxu0  ;;  %v794_v21 = vpop.f32.mrf.mxu1 }
 0x36e   :  { %v817_v23 = vadd.f32 %v774_v16, %v181_v7  ;;  %v837_v26 = vadd.f32 %v794_v21, %v227_v12  ;;  %v184_v7 = vadd.f32 %v1837_v42, %v1917_v60 }
 0x370   :  { %v1266_v27 = vmul.f32 -1.442695, %v817_v23  ;;  %v1267_v13 = vmul.f32 -1.442695, %v837_v26 }
 0x372   :  { %1335 = vpow2.f32 %v1266_v27 }
 0x373   :  { %1337 = vpow2.f32 %v1267_v13 }
 0x374   :  { %v814_v40 = vpop.f32.mrf.mxu2 }
 0x375   :  { %v815_v63 = vadd.f32 %v1867_v8, %v814_v40 }
 0x378   :  { %v1336_v28 = vpop.eup %1335 }
 0x379   :  { %v1338_v29 = vpop.eup %1337  ;;  %v821_v30 = vadd.f32 1.0, %v1336_v28 }
 0x37a   :  { %v841_v15 = vadd.f32 1.0, %v1338_v29 }
 0x37b   :  { %1339 = vrcp.f32 %v821_v30  ;;  %v833_v58 = vand.u32 2147483648, %v821_v30  ;;  %v831_v22 = vand.u32 2147483647, %v821_v30  ;;  %vm827_vm5 = vweird.f32 %v821_v30 }
 0x37c   :  { %1341 = vrcp.f32 %v841_v15  ;;  %v853_v1 = vand.u32 2147483648, %v841_v15  ;;  %vm847_vm9 = vweird.f32 %v841_v15  ;;  %v851_v2 = vand.u32 2147483647, %v841_v15 }
 0x37d   :  { %v834_v52 = vor.u32 1.1754944e-38, %v833_v58  ;;  %vm832_vm7 = vcmp.eq.f32.partialorder %v831_v22, 8.507059e+37 }
 0x37e   :  { %v854_v53 = vor.u32 1.1754944e-38, %v853_v1  ;;  %vm852_vm11 = vcmp.eq.f32.partialorder %v851_v2, 8.507059e+37  ;;  %v233_v1 = vadd.f32 %v1855_v50, %v1933_v25 }
 0x381   :  { %v1340_v31 = vpop.eup %1339 }
 0x382   :  { %v1342_v32 = vpop.eup %1341  ;;  %v823_v33 = vmul.f32 %v1340_v31, %v821_v30  ;;  %vm828_vm4 = vweird.f32 %v1340_v31 }
 0x383   :  { %v843_v36 = vmul.f32 %v1342_v32, %v841_v15  ;;  %vm829_vm6 = vmor %vm827_vm5, %vm828_vm4  ;;  %vm848_vm8 = vweird.f32 %v1342_v32 }
 0x384   :  { %v824_v34 = vsub.f32 1.0, %v823_v33  ;;  %vm849_vm10 = vmor %vm847_vm9, %vm848_vm8 }
 0x385   :  { %v844_v56 = vsub.f32 1.0, %v843_v36 }
 0x386   :  { %v825_v4 = vmul.f32 %v1340_v31, %v824_v34 }
 0x387   :  { %v845_v49 = vmul.f32 %v1342_v32, %v844_v56 }
 0x388   :  { %v826_v47 = vadd.f32 %v1340_v31, %v825_v4  ;;  %v276_v4 = vadd.f32 %v1872_v10, %v1978_v20  ;;  %v187_v20 = vadd.f32 %v1837_v42, %v1921_v62 }
 0x389   :  { %v846_v11 = vadd.f32 %v1342_v32, %v845_v49 }
 0x38a   :  { %v830_v45 = vsel %vm829_vm6, %v1340_v31, %v826_v47 }
 0x38b   :  { %v835_v48 = vsel %vm832_vm7, %v834_v52, %v830_v45  ;;  %v850_v5 = vsel %vm849_vm10, %v1342_v32, %v846_v11 }
 0x38c   :  { %v857_v61 = vmul.f32 %v835_v48, %v815_v63  ;;  %v855_v6 = vsel %vm852_vm11, %v854_v53, %v850_v5 }
 0x38e   :  { %v858_v9 = vadd.f32 %v857_v61, %v273_v54 }
 0x390   :  { %1343 = vtanh.f32 %v858_v9 }
 0x396   :  { %v1344_v44 = vpop.eup %1343 }
 0x397   :  { %v860_v55 = vsub.f32 %v2033_v57, %v1344_v44  ;;  %v230_v57 = vadd.f32 %v1855_v50, %v1930_v14 }
 0x399   :  { %v861_v43 = vmul.f32 %v860_v55, %v855_v6 }
 0x39b   :  { %v2081_v51 = vadd.f32 %v1344_v44, %v861_v43 }
 0x39d   :  { %864 = vst.msk [vmem:[#allocation11 + $0x20] sm:$0xff] %vm309_vm1, %v2081_v51  ;;  %1268 = vmatmul.msk.f32.vlgmr.msra.gmra.mxu3 %vm309_vm1, %v2081_v51  ;;  %1269 = vmatmul.msk.f32.vlgmr.msra.gmra.mxu0 %vm309_vm1, %v2081_v51 }
 0x39e   :  { %1270 = vmatmul.msk.f32.vlgmr.msra.gmra.mxu1 %vm309_vm1, %v2081_v51  ;;  %1138 = vmatpush.msra.mxu3 %v1378_v46 }
 0x3a0   :  { %1139 = vmatpush.msra.mxu3 %v1379_v18 }
 0x3a2   :  { %1140 = vmatpush.msra.mxu3 %v1380_v19 }
 0x3a4   :  { %1141 = vmatpush.msra.mxu3 %v1381_v24 }
 0x3a6   :  { %1142 = vmatpush.msra.mxu3 %v1382_v39 }
 0x3a8   :  { %1143 = vmatpush.msra.mxu3 %v1742_v35 }
 0x3aa   :  { %1144 = vmatpush.msra.mxu3 %v1750_v37 }
 0x3ac   :  { %1145 = vmatpush.msra.mxu3 %v1756_v38 }
 0x41a   :  { %v905_v41 = vpop.f32.mrf.mxu0 }
 0x41b   :  { %v948_v17 = vadd.f32 %v905_v41, %v230_v57  ;;  %v925_v15 = vpop.f32.mrf.mxu1 }
 0x41c   :  { %v926_v34 = vadd.f32 %v1867_v8, %v925_v15 }
 0x41d   :  { %v1272_v0 = vmul.f32 -1.442695, %v948_v17 }
 0x41f   :  { %1345 = vpow2.f32 %v1272_v0 }
 0x420   :  { %v885_v12 = vpop.f32.mrf.mxu3 }
 0x421   :  { %v928_v16 = vadd.f32 %v885_v12, %v184_v7 }
 0x423   :  { %v1271_v21 = vmul.f32 -1.442695, %v928_v16 }
 0x425   :  { %1347 = vpow2.f32 %v1271_v21  ;;  %v1346_v23 = vpop.eup %1345 }
 0x426   :  { %v952_v26 = vadd.f32 1.0, %v1346_v23  ;;  %v279_v23 = vadd.f32 %v1872_v10, %v1980_v59  ;;  %v1383_v10 = vld [vmem:[%s2154_s8] ss:$0 sm:$0xff] }
 0x427   :  { %v190_v59 = vadd.f32 %v1383_v10, %v1925_v3 }
 0x428   :  { %v964_v52 = vand.u32 2147483648, %v952_v26  ;;  %vm958_vm2 = vweird.f32 %v952_v26  ;;  %v962_v63 = vand.u32 2147483647, %v952_v26 }
 0x42a   :  { %v965_v54 = vor.u32 1.1754944e-38, %v964_v52  ;;  %vm963_vm4 = vcmp.eq.f32.partialorder %v962_v63, 8.507059e+37 }
 0x42b   :  { %v1348_v35 = vpop.eup %1347 }
 0x42c   :  { %v932_v37 = vadd.f32 1.0, %v1348_v35 }
 0x42e   :  { %1349 = vrcp.f32 %v932_v37  ;;  %v944_v29 = vand.u32 2147483648, %v932_v37  ;;  %v942_v60 = vand.u32 2147483647, %v932_v37  ;;  %vm938_vm13 = vweird.f32 %v932_v37 }
 0x42f   :  { %1351 = vrcp.f32 %v952_v26 }
 0x430   :  { %v945_v33 = vor.u32 1.1754944e-38, %v944_v29  ;;  %vm943_vm15 = vcmp.eq.f32.partialorder %v942_v60, 8.507059e+37 }
 0x434   :  { %v1350_v38 = vpop.eup %1349 }
 0x435   :  { %v1352_v27 = vpop.eup %1351  ;;  %v934_v14 = vmul.f32 %v1350_v38, %v932_v37  ;;  %vm939_vm12 = vweird.f32 %v1350_v38 }
 0x436   :  { %v954_v28 = vmul.f32 %v1352_v27, %v952_v26  ;;  %vm940_vm14 = vmor %vm938_vm13, %vm939_vm12  ;;  %vm959_vm0 = vweird.f32 %v1352_v27 }
 0x437   :  { %v935_v13 = vsub.f32 1.0, %v934_v14  ;;  %vm960_vm3 = vmor %vm958_vm2, %vm959_vm0 }
 0x438   :  { %v955_v32 = vsub.f32 1.0, %v954_v28 }
 0x439   :  { %v936_v30 = vmul.f32 %v1350_v38, %v935_v13 }
 0x43a   :  { %v956_v40 = vmul.f32 %v1352_v27, %v955_v32 }
 0x43b   :  { %v937_v31 = vadd.f32 %v1350_v38, %v936_v30 }
 0x43c   :  { %v957_v56 = vadd.f32 %v1352_v27, %v956_v40 }
 0x43d   :  { %v941_v36 = vsel %vm940_vm14, %v1350_v38, %v937_v31 }
 0x43e   :  { %v946_v58 = vsel %vm943_vm15, %v945_v33, %v941_v36  ;;  %v961_v45 = vsel %vm960_vm3, %v1352_v27, %v957_v56  ;;  %v2158_v36 = vld [vmem:[#allocation16_spill] sm:$0xff] }
 0x43f   :  { %v968_v22 = vmul.f32 %v946_v58, %v926_v34  ;;  %v966_v49 = vsel %vm963_vm4, %v965_v54, %v961_v45  ;;  %v1384_v34 = vld [vmem:[%s2154_s8 + $0x1] ss:$0 sm:$0xff] }
 0x440   :  { %v236_v58 = vadd.f32 %v1384_v34, %v2158_v36 }
 0x441   :  { %v969_v47 = vadd.f32 %v968_v22, %v276_v4 }
 0x443   :  { %1353 = vtanh.f32 %v969_v47 }
 0x449   :  { %v1354_v48 = vpop.eup %1353 }
 0x44a   :  { %v971_v61 = vsub.f32 %v2081_v51, %v1354_v48 }
 0x44c   :  { %v972_v9 = vmul.f32 %v971_v61, %v966_v49 }
 0x44e   :  { %v973_v11 = vadd.f32 %v1354_v48, %v972_v9 }
 0x450   :  { %975 = vst.msk [vmem:[#allocation11 + $0x28] sm:$0xff] %vm309_vm1, %v973_v11  ;;  %1273 = vmatmul.msk.f32.vlgmr.msra.gmra.mxu2 %vm309_vm1, %v973_v11  ;;  %1274 = vmatmul.msk.f32.vlgmr.msrb.gmra.mxu3 %vm309_vm1, %v973_v11 }
 0x451   :  { %1275 = vmatmul.msk.f32.vlgmr.msrb.gmra.mxu0 %vm309_vm1, %v973_v11 }
 0x4ce   :  { %v1036_v41 = vpop.f32.mrf.mxu0 }
 0x4cf   :  { %v1037_v12 = vadd.f32 %v1867_v8, %v1036_v41 }
 0x4d3   :  { %v996_v2 = vpop.f32.mrf.mxu2  ;;  %v1016_v5 = vpop.f32.mrf.mxu3 }
 0x4d4   :  { %v1039_v44 = vadd.f32 %v996_v2, %v187_v20  ;;  %v1059_v53 = vadd.f32 %v1016_v5, %v233_v1 }
 0x4d6   :  { %v1276_v55 = vmul.f32 -1.442695, %v1039_v44  ;;  %v1277_v6 = vmul.f32 -1.442695, %v1059_v53  ;;  %v1385_v44 = vld [vmem:[%s2154_s8 + $0x3] ss:$0 sm:$0xff] }
 0x4d8   :  { %1355 = vpow2.f32 %v1276_v55 }
 0x4d9   :  { %1357 = vpow2.f32 %v1277_v6 }
 0x4de   :  { %v1356_v43 = vpop.eup %1355 }
 0x4df   :  { %v1358_v51 = vpop.eup %1357  ;;  %v1043_v46 = vadd.f32 1.0, %v1356_v43  ;;  %v1386_v43 = vld [vmem:[%s2154_s8 + $0x2] ss:$0 sm:$0xff]  ;;  %s1546_s8 = smov [#allocation11]  }
 0x4e0   :  { %v1063_v18 = vadd.f32 1.0, %v1358_v51  ;;  %v2159_v51 = vld [vmem:[#allocation17_spill] sm:$0xff]  ;;  %s1202_s3 = sshll.u32 %s1546_s8, 4  ;;  %s1203_s3 = int_to_ptr.vmem [resolvable:$true] %s1202_s3 }
 0x4e1   :  { %1359 = vrcp.f32 %v1043_v46  ;;  %v1055_v39 = vand.u32 2147483648, %v1043_v46  ;;  %v1053_v57 = vand.u32 2147483647, %v1043_v46  ;;  %vm1049_vm6 = vweird.f32 %v1043_v46 }
 0x4e2   :  { %1361 = vrcp.f32 %v1063_v18  ;;  %v1075_v27 = vand.u32 2147483648, %v1063_v18  ;;  %vm1069_vm10 = vweird.f32 %v1063_v18  ;;  %v1073_v14 = vand.u32 2147483647, %v1063_v18 }
 0x4e3   :  { %v1056_v0 = vor.u32 1.1754944e-38, %v1055_v39  ;;  %vm1054_vm8 = vcmp.eq.f32.partialorder %v1053_v57, 8.507059e+37 }
 0x4e4   :  { %v1076_v29 = vor.u32 1.1754944e-38, %v1075_v27  ;;  %vm1074_vm12 = vcmp.eq.f32.partialorder %v1073_v14, 8.507059e+37 }
 0x4e7   :  { %v1360_v19 = vpop.eup %1359 }
 0x4e8   :  { %v1362_v24 = vpop.eup %1361  ;;  %v1045_v42 = vmul.f32 %v1360_v19, %v1043_v46  ;;  %vm1050_vm5 = vweird.f32 %v1360_v19  ;;  %v282_v46 = vadd.f32 %v1386_v43, %v2159_v51 }
 0x4e9   :  { %v1065_v50 = vmul.f32 %v1362_v24, %v1063_v18  ;;  %vm1051_vm7 = vmor %vm1049_vm6, %vm1050_vm5  ;;  %vm1070_vm9 = vweird.f32 %v1362_v24 }
 0x4ea   :  { %v1046_v62 = vsub.f32 1.0, %v1045_v42  ;;  %vm1071_vm11 = vmor %vm1069_vm10, %vm1070_vm9 }
 0x4eb   :  { %v1066_v7 = vsub.f32 1.0, %v1065_v50 }
 0x4ec   :  { %v1047_v25 = vmul.f32 %v1360_v19, %v1046_v62 }
 0x4ed   :  { %v1067_v26 = vmul.f32 %v1362_v24, %v1066_v7 }
 0x4ee   :  { %v1048_v17 = vadd.f32 %v1360_v19, %v1047_v25 }
 0x4ef   :  { %v1068_v38 = vadd.f32 %v1362_v24, %v1067_v26 }
 0x4f0   :  { %v1052_v16 = vsel %vm1051_vm7, %v1360_v19, %v1048_v17 }
 0x4f1   :  { %v1057_v21 = vsel %vm1054_vm8, %v1056_v0, %v1052_v16  ;;  %v1072_v13 = vsel %vm1071_vm11, %v1362_v24, %v1068_v38 }
 0x4f2   :  { %v1079_v35 = vmul.f32 %v1057_v21, %v1037_v12  ;;  %v1077_v30 = vsel %vm1074_vm12, %v1076_v29, %v1072_v13 }
 0x4f4   :  { %v1080_v37 = vadd.f32 %v1079_v35, %v279_v23 }
 0x4f6   :  { %1363 = vtanh.f32 %v1080_v37 }
 0x4fc   :  { %v1364_v28 = vpop.eup %1363 }
 0x4fd   :  { %v1082_v8 = vsub.f32 %v973_v11, %v1364_v28 }
 0x4ff   :  { %v1083_v60 = vmul.f32 %v1082_v8, %v1077_v30 }
 0x501   :  { %v2113_v15 = vadd.f32 %v1364_v28, %v1083_v60 }
 0x503   :  { %1086 = vst.msk [vmem:[#allocation11 + $0x30] sm:$0xff] %vm309_vm1, %v2113_v15  ;;  %1278 = vmatmul.msk.f32.vlgmr.msrb.gmra.mxu1 %vm309_vm1, %v2113_v15  ;;  %1279 = vmatmul.msk.f32.vlgmr.msrb.gmra.mxu2 %vm309_vm1, %v2113_v15 }
 0x504   :  { %1280 = vmatmul.msk.f32.vlgmr.msra.gmra.mxu3 %vm309_vm1, %v2113_v15 }
 0x580   :  { %v1107_v31 = vpop.f32.mrf.mxu1 }
 0x581   :  { %v1150_v32 = vadd.f32 %v1107_v31, %v190_v59 }
 0x583   :  { %v1281_v33 = vmul.f32 -1.442695, %v1150_v32 }
 0x585   :  { %1365 = vpow2.f32 %v1281_v33 }
 0x586   :  { %v1127_v4 = vpop.f32.mrf.mxu2 }
 0x587   :  { %v1170_v22 = vadd.f32 %v1127_v4, %v236_v58  ;;  %v1147_v11 = vpop.f32.mrf.mxu3 }
 0x588   :  { %v1148_v53 = vadd.f32 %v1385_v44, %v1147_v11 }
 0x589   :  { %v1282_v40 = vmul.f32 -1.442695, %v1170_v22 }
 0x58b   :  { %v1366_v47 = vpop.eup %1365  ;;  %1367 = vpow2.f32 %v1282_v40 }
 0x58c   :  { %v1154_v56 = vadd.f32 1.0, %v1366_v47 }
 0x58e   :  { %1369 = vrcp.f32 %v1154_v56  ;;  %v1166_v54 = vand.u32 2147483648, %v1154_v56  ;;  %v1164_v49 = vand.u32 2147483647, %v1154_v56  ;;  %vm1160_vm14 = vweird.f32 %v1154_v56 }
 0x590   :  { %v1167_v2 = vor.u32 1.1754944e-38, %v1166_v54  ;;  %vm1165_vm0 = vcmp.eq.f32.partialorder %v1164_v49, 8.507059e+37 }
 0x591   :  { %v1368_v52 = vpop.eup %1367 }
 0x592   :  { %v1174_v63 = vadd.f32 1.0, %v1368_v52 }
 0x594   :  { %v1370_v3 = vpop.eup %1369  ;;  %1371 = vrcp.f32 %v1174_v63  ;;  %v1186_v62 = vand.u32 2147483648, %v1174_v63  ;;  %vm1180_vm3 = vweird.f32 %v1174_v63  ;;  %v1184_v39 = vand.u32 2147483647, %v1174_v63 }
 0x595   :  { %v1156_v45 = vmul.f32 %v1370_v3, %v1154_v56  ;;  %vm1161_vm13 = vweird.f32 %v1370_v3 }
 0x596   :  { %vm1162_vm15 = vmor %vm1160_vm14, %vm1161_vm13  ;;  %v1187_v57 = vor.u32 1.1754944e-38, %v1186_v62  ;;  %vm1185_vm5 = vcmp.eq.f32.partialorder %v1184_v39, 8.507059e+37 }
 0x597   :  { %v1157_v48 = vsub.f32 1.0, %v1156_v45 }
 0x599   :  { %v1158_v61 = vmul.f32 %v1370_v3, %v1157_v48 }
 0x59a   :  { %v1372_v9 = vpop.eup %1371 }
 0x59b   :  { %v1176_v20 = vmul.f32 %v1372_v9, %v1174_v63  ;;  %v1159_v1 = vadd.f32 %v1370_v3, %v1158_v61  ;;  %vm1181_vm2 = vweird.f32 %v1372_v9 }
 0x59c   :  { %vm1182_vm4 = vmor %vm1180_vm3, %vm1181_vm2 }
 0x59d   :  { %v1177_v5 = vsub.f32 1.0, %v1176_v20  ;;  %v1163_v55 = vsel %vm1162_vm15, %v1370_v3, %v1159_v1 }
 0x59e   :  { %v1168_v6 = vsel %vm1165_vm0, %v1167_v2, %v1163_v55 }
 0x59f   :  { %v1190_v18 = vmul.f32 %v1168_v6, %v1148_v53  ;;  %v1178_v19 = vmul.f32 %v1372_v9, %v1177_v5 }
 0x5a1   :  { %v1191_v24 = vadd.f32 %v1190_v18, %v282_v46  ;;  %v1179_v42 = vadd.f32 %v1372_v9, %v1178_v19 }
 0x5a3   :  { %1373 = vtanh.f32 %v1191_v24  ;;  %v1183_v50 = vsel %vm1182_vm4, %v1372_v9, %v1179_v42 }
 0x5a4   :  { %v1188_v17 = vsel %vm1185_vm5, %v1187_v57, %v1183_v50 }
 0x5a9   :  { %v1374_v25 = vpop.eup %1373 }
 0x5aa   :  { %v1193_v41 = vsub.f32 %v2113_v15, %v1374_v25 }
 0x5ac   :  { %v1194_v0 = vmul.f32 %v1193_v41, %v1188_v17 }
 0x5ae   :  { %v1195_v7 = vadd.f32 %v1374_v25, %v1194_v0 }
 0x5b0   :  { %1197 = vst.msk [vmem:[#allocation11 + $0x38] sm:$0xff] %vm309_vm1, %v1195_v7 }
 0x5b1   :  { %1210 = dma.vmem_to_hbm [thread:$0]  %s1203_s3, 1024, %s1205_s23, [#allocation4], %s1540_s17, %s1540_s17, %s1541_s18  }
 0x5b2   :  { %1537 = dma.done.wait [#allocation4], 1024  }
 0x5b3   :  { %1538 = vsyncadd [#allocation4], 4294966272 }
 0x5b4   :  { %1215 = vsyncpa [#allocation3], 1 }
 0x5b5   :  { %1216 = vsyncpa [#allocation6], 1 }
 0x5b6   :  { %1217 = vsyncpa [#allocation9], 1 }
 0x5b7   :  { %1218 = vsyncpa [#allocation4], 1 }

</bundles_post_ra>
